<compile_context>
chip_gen: v5e
topology: v5e:2x2
jax: 0.10.0
libtpu: 0.0.40
codegen_flags: <defaults>
</compile_context>

<pallas_src>
import functools

import jax
import jax.numpy as jnp
from jax.experimental import pallas as pl
from jax.experimental.pallas import tpu as pltpu


# ----------------------------------------------------------------------------
# Fused kernel body: one (batch, pooled-row-tile) grid cell.
# ----------------------------------------------------------------------------
def _down_kernel(x_top_ref, x_main_ref, x_bot_ref,
                 w1_ref, b1_ref, w2_ref, b2_ref, o_ref,
                 q1_ref, q2_ref, *, Tr, Wo, Cin, Cmid):
    t = pl.program_id(1)
    n_tiles = pl.num_programs(1)
    P0 = 8                       # flat pad before q1 data (dx=-1 tap reach)
    Q0 = 8                       # flat pad before q2 data
    M1 = (Tr + 2) * Wo           # conv1 rows: owned rows + 1 halo row per side
    M2 = Tr * Wo                 # conv2 / output rows: owned rows only

    # ---- fused 2x2 max pool (x glue-reshaped so the W pair sits on lanes) ---
    def pool2x2(xblk, rows_out):
        xv = xblk.reshape(rows_out, 2, Wo, 2 * Cin).astype(jnp.float32)
        hmax = jnp.max(xv, axis=1)                            # (rows, Wo, 2Cin)
        p = jnp.maximum(hmax[..., :Cin], hmax[..., Cin:])     # (rows, Wo, Cin)
        return p.reshape(rows_out * Wo, Cin)                  # Wo%8==0 -> keep

    # q1 holds pooled rows [r0-2, r0+Tr+2), flat row-major with stride Wo.
    # Halo rows outside the image are zeroed (conv1 "SAME" padding).  All the
    # pl.when gating below is intra-step only (safe with "parallel" axes).
    top = pool2x2(x_top_ref[0], 2)
    bot = pool2x2(x_bot_ref[0], 2)
    zero2 = jnp.zeros((2 * Wo, Cin), jnp.float32)

    @pl.when(t > 0)
    def _():
        q1_ref[pl.ds(P0, 2 * Wo), :] = top

    @pl.when(t == 0)
    def _():
        q1_ref[pl.ds(P0, 2 * Wo), :] = zero2

    q1_ref[pl.ds(P0 + 2 * Wo, M2), :] = pool2x2(x_main_ref[0], Tr)

    @pl.when(t < n_tiles - 1)
    def _():
        q1_ref[pl.ds(P0 + (Tr + 2) * Wo, 2 * Wo), :] = bot

    @pl.when(t == n_tiles - 1)
    def _():
        q1_ref[pl.ds(P0 + (Tr + 2) * Wo, 2 * Wo), :] = zero2

    # ---- 3x3 conv as ONE (M, 9C) @ (9C, Cout) bf16 MXU matmul ---------------
    def conv3x3_bias_relu(q_ref, base, M, w_ref, b_ref):
        col = jax.lax.broadcasted_iota(jnp.int32, (M, 1), 0) % Wo
        not_left = col != 0                  # dx = -1 invalid at column 0
        not_right = col != (Wo - 1)          # dx = +1 invalid at column Wo-1
        pieces = []
        for dy in (-1, 0, 1):
            for dx in (-1, 0, 1):
                sl = q_ref[pl.ds(base + dy * Wo + dx, M), :]   # contiguous slice
                sl = sl.astype(jnp.bfloat16)                   # bf16 im2col
                if dx == -1:
                    sl = jnp.where(not_left, sl, jnp.zeros_like(sl))
                elif dx == 1:
                    sl = jnp.where(not_right, sl, jnp.zeros_like(sl))
                pieces.append(sl)
        # TODO(synk): if vld/relayout-bound, build dx=+-1 taps from the aligned
        #             dy slice with pltpu.roll (XLU) instead of offset slices.
        im2col = jnp.concatenate(pieces, axis=-1)              # (M, 9C) bf16
        acc = jnp.dot(im2col, w_ref[...], preferred_element_type=jnp.float32)
        return jnp.maximum(acc + b_ref[...], 0.0)              # BN folded in w,b

    # conv1 over pooled rows [r0-1, r0+Tr+1) -> q2 (flat, stride Wo)
    y1 = conv3x3_bias_relu(q1_ref, P0 + Wo, M1, w1_ref, b1_ref)
    q2_ref[pl.ds(Q0, M1), :] = y1

    # conv2's zero ("SAME") padding rows at the image top / bottom.
    zrow = jnp.zeros((Wo, Cmid), jnp.float32)

    @pl.when(t == 0)
    def _():
        q2_ref[pl.ds(Q0, Wo), :] = zrow

    @pl.when(t == n_tiles - 1)
    def _():
        q2_ref[pl.ds(Q0 + (Tr + 1) * Wo, Wo), :] = zrow

    # conv2 over the Tr owned rows -> single dense bf16 store
    y2 = conv3x3_bias_relu(q2_ref, Q0 + Wo, M2, w2_ref, b2_ref)
    o_ref[0] = y2.astype(o_ref.dtype)


# ----------------------------------------------------------------------------
# VMEM sizing helpers (lane-padded, double-buffered estimate).
# ----------------------------------------------------------------------------
def _estimate_vmem_bytes(Tr, Wo, Cin, Cmid, Cout):
    bf, f32 = 2, 4
    M1, M2 = (Tr + 2) * Wo, Tr * Wo
    c128 = lambda c: (c + 127) // 128 * 128
    b = 2 * ((2 * Tr + 8) * Wo) * c128(2 * Cin) * bf            # x blocks (x2)
    b += 2 * M2 * c128(Cout) * bf                               # out block (x2)
    b += 2 * (9 * Cin * c128(Cmid) + 9 * Cmid * c128(Cout)) * bf  # weights
    b += ((Tr + 4) * Wo + 16) * c128(Cin) * f32                 # q1 scratch
    b += ((Tr + 2) * Wo + 16) * c128(Cmid) * f32                # q2 scratch
    b += M1 * c128(9 * Cin) * bf + M2 * c128(9 * Cmid) * bf     # bf16 im2col
    b += M1 * c128(Cmid) * f32 + M2 * c128(Cout) * f32          # f32 accums
    return b


def _pick_row_tile(Ho, Wo, Cin, Cmid, Cout, budget_bytes):
    cands = [d for d in range(Ho, 1, -1) if Ho % d == 0 and d % 2 == 0]
    for d in cands:
        if _estimate_vmem_bytes(d, Wo, Cin, Cmid, Cout) <= budget_bytes:
            return d
    return cands[-1] if cands else Ho


# ----------------------------------------------------------------------------
# Pallas wrapper.
# ----------------------------------------------------------------------------
def down_pallas(x_nhwc, w1p, b1, w2p, b2, *, row_tile=None,
                vmem_budget_bytes=40 * 1024 * 1024):
    N, H, W, Cin = x_nhwc.shape
    assert H % 4 == 0 and W % 2 == 0
    Ho, Wo = H // 2, W // 2
    assert Wo % 8 == 0, "Wo must be a multiple of 8 (sublane tile)"
    Cmid, Cout = w1p.shape[-1], w2p.shape[-1]

    Tr = row_tile or _pick_row_tile(Ho, Wo, Cin, Cmid, Cout, vmem_budget_bytes)
    assert Ho % Tr == 0 and Tr % 2 == 0
    T = Ho // Tr
    half = Tr // 2                 # tile extent in 4-input-row halo blocks
    Hq = H // 4                    # number of 4-input-row blocks along H
    M2 = Tr * Wo

    # Row-major regroup of the last two dims so the 2-wide W window sits on
    # lanes (pairs with the NCHW->NHWC transpose + bf16 cast done in glue).
    xr = x_nhwc.reshape(N, H, Wo, 2 * Cin)

    L1 = (Tr + 4) * Wo + 16        # flat pooled scratch (2 halo rows per side)
    L2 = (Tr + 2) * Wo + 16        # flat conv1 scratch (1 halo row per side)

    est = _estimate_vmem_bytes(Tr, Wo, Cin, Cmid, Cout)
    vmem_limit = int(min(100 << 20, max(32 << 20, est * 5 // 4 + (4 << 20))))

    kernel = functools.partial(_down_kernel, Tr=Tr, Wo=Wo, Cin=Cin, Cmid=Cmid)

    out_flat = pl.pallas_call(
        kernel,
        out_shape=jax.ShapeDtypeStruct((N, Ho * Wo, Cout), jnp.bfloat16),
        grid=(N, T),
        in_specs=[
            # 2 pooled halo rows above the tile (block index clamped at top).
            pl.BlockSpec((1, 4, Wo, 2 * Cin),
                         lambda n, t: (n, jnp.maximum(t * half - 1, 0), 0, 0)),
            # the 2*Tr input rows owned by the tile.
            pl.BlockSpec((1, 2 * Tr, Wo, 2 * Cin), lambda n, t: (n, t, 0, 0)),
            # 2 pooled halo rows below the tile (clamped at the bottom).
            pl.BlockSpec((1, 4, Wo, 2 * Cin),
                         lambda n, t: (n, jnp.minimum((t + 1) * half, Hq - 1),
                                       0, 0)),
            # folded conv/BN weights & biases: constant index maps -> resident.
            pl.BlockSpec((9 * Cin, Cmid), lambda n, t: (0, 0)),
            pl.BlockSpec((1, Cmid), lambda n, t: (0, 0)),
            pl.BlockSpec((9 * Cmid, Cout), lambda n, t: (0, 0)),
            pl.BlockSpec((1, Cout), lambda n, t: (0, 0)),
        ],
        out_specs=pl.BlockSpec((1, M2, Cout), lambda n, t: (n, t, 0)),
        scratch_shapes=[
            pltpu.VMEM((L1, Cin), jnp.float32),    # pooled rows + 2-row halos
            pltpu.VMEM((L2, Cmid), jnp.float32),   # conv1 rows + 1-row halos
        ],
        compiler_params=pltpu.CompilerParams(
            dimension_semantics=("parallel", "parallel"),
            vmem_limit_bytes=vmem_limit),
    )(xr, xr, xr, w1p, b1, w2p, b2)
    return out_flat.reshape(N, Ho, Wo, Cout)


# ----------------------------------------------------------------------------
# Glue: BN folding / weight packing, parameters, forward wrapper.
# ----------------------------------------------------------------------------
def fold_bn(conv_bias, gamma, beta, running_mean, running_var, eps=1e-5):
    scale = gamma / jnp.sqrt(running_var + eps)
    bias = beta + (conv_bias - running_mean) * scale
    return scale, bias


def pack_conv_bn(w_hwio, conv_bias, gamma, beta, mean, var, eps=1e-5):
    scale, bias = fold_bn(conv_bias, gamma, beta, mean, var, eps)
    wf = (w_hwio * scale).reshape(-1, w_hwio.shape[-1])        # (9*Cin, Cout)
    return wf.astype(jnp.bfloat16), bias.reshape(1, -1).astype(jnp.float32)


def init_down_params(key, in_channels, out_channels):
    mid_channels = out_channels
    k = jax.random.split(key, 8)
    p = {}
    p["w1"] = 0.1 * jax.random.normal(k[0], (3, 3, in_channels, mid_channels), jnp.float32)
    p["cb1"] = 0.1 * jax.random.normal(k[1], (mid_channels,), jnp.float32)
    p["g1"] = 1.0 + 0.1 * jax.random.normal(k[2], (mid_channels,), jnp.float32)
    p["be1"] = 0.1 * jax.random.normal(k[3], (mid_channels,), jnp.float32)
    p["m1"] = jnp.zeros((mid_channels,), jnp.float32)
    p["v1"] = jnp.ones((mid_channels,), jnp.float32)
    p["w2"] = 0.1 * jax.random.normal(k[4], (3, 3, mid_channels, out_channels), jnp.float32)
    p["cb2"] = 0.1 * jax.random.normal(k[5], (out_channels,), jnp.float32)
    p["g2"] = 1.0 + 0.1 * jax.random.normal(k[6], (out_channels,), jnp.float32)
    p["be2"] = 0.1 * jax.random.normal(k[7], (out_channels,), jnp.float32)
    p["m2"] = jnp.zeros((out_channels,), jnp.float32)
    p["v2"] = jnp.ones((out_channels,), jnp.float32)
    return p


@jax.jit
def down_forward(x_nchw, p):
    # bf16 NHWC in / bf16 out: halves HBM traffic; max-pool commutes with the
    # bf16 round and the convs already consume bf16, so accuracy is unchanged.
    x = jnp.transpose(x_nchw, (0, 2, 3, 1)).astype(jnp.bfloat16)
    w1p, b1 = pack_conv_bn(p["w1"], p["cb1"], p["g1"], p["be1"], p["m1"], p["v1"])
    w2p, b2 = pack_conv_bn(p["w2"], p["cb2"], p["g2"], p["be2"], p["m2"], p["v2"])
    y = down_pallas(x, w1p, b1, w2p, b2)
    return jnp.transpose(y, (0, 3, 1, 2)).astype(jnp.float32)


# ----------------------------------------------------------------------------
# Reference (same folded weights, bf16 operands / f32 accumulate like the MXU).
# ----------------------------------------------------------------------------
def ref_down(x_nchw, p):
    x = jnp.transpose(x_nchw, (0, 2, 3, 1))
    x = jax.lax.reduce_window(x, -jnp.inf, jax.lax.max,
                              (1, 2, 2, 1), (1, 2, 2, 1), "VALID")

    def block(x, w_hwio, cb, g, be, m, v):
        wf, b = pack_conv_bn(w_hwio, cb, g, be, m, v)
        wf = wf.reshape(w_hwio.shape)                          # bf16, BN folded
        y = jax.lax.conv_general_dilated(
            x.astype(jnp.bfloat16), wf, (1, 1), "SAME",
            dimension_numbers=("NHWC", "HWIO", "NHWC"),
            preferred_element_type=jnp.float32)
        return jnp.maximum(y + b, 0.0)

    x = block(x, p["w1"], p["cb1"], p["g1"], p["be1"], p["m1"], p["v1"])
    x = block(x, p["w2"], p["cb2"], p["g2"], p["be2"], p["m2"], p["v2"])
    return jnp.transpose(x, (0, 3, 1, 2))


if __name__ == "__main__":
    key = jax.random.PRNGKey(0)
    kx, kp = jax.random.split(key)

    N, Cin, H, W = 2, 4, 16, 16
    Cout = 8
    x = jax.random.normal(kx, (N, Cin, H, W), jnp.float32)
    params = init_down_params(kp, Cin, Cout)

    out = jax.block_until_ready(down_forward(x, params))
    ref = ref_down(x, params)

    assert out.shape == (N, Cout, H // 2, W // 2), out.shape
    # bf16 MXU operands + bf16 output store -> loosened tolerance vs f32 ref.
    assert jnp.allclose(out, ref, rtol=1e-2, atol=1e-2), float(
        jnp.max(jnp.abs(out - ref)))

    print("KERNEL_OK")
</pallas_src>

<mosaic_0001>
module attributes {stable_mosaic.version = 11 : i64} {
  func.func @_down_kernel(%arg0: i32, %arg1: i32, %arg2: memref<1x4x8x8xbf16, #tpu.memory_space<vmem>>, %arg3: memref<1x16x8x8xbf16, #tpu.memory_space<vmem>>, %arg4: memref<1x4x8x8xbf16, #tpu.memory_space<vmem>>, %arg5: memref<36x8xbf16, #tpu.memory_space<vmem>>, %arg6: memref<1x8xf32, #tpu.memory_space<vmem>>, %arg7: memref<72x8xbf16, #tpu.memory_space<vmem>>, %arg8: memref<1x8xf32, #tpu.memory_space<vmem>>, %arg9: memref<1x64x8xbf16, #tpu.memory_space<vmem>>, %arg10: memref<112x4xf32, #tpu.memory_space<vmem>>, %arg11: memref<96x8xf32, #tpu.memory_space<vmem>>) attributes {dimension_semantics = [#tpu.dimension_semantics<parallel>, #tpu.dimension_semantics<parallel>], iteration_bounds = array<i64: 2, 1>, scalar_prefetch = 0 : i64, scratch_operands = 2 : i64, tpu.core_type = #tpu.core_type<tc>, window_params = [{transform_indices = @transform_0, window_bounds = array<i64: 1, 4, 8, 8>}, {transform_indices = @transform_1, window_bounds = array<i64: 1, 16, 8, 8>}, {transform_indices = @transform_2, window_bounds = array<i64: 1, 4, 8, 8>}, {pipeline_mode = #tpu.pipeline_mode<synchronous>, transform_indices = @transform_3, window_bounds = array<i64: 36, 8>}, {pipeline_mode = #tpu.pipeline_mode<synchronous>, transform_indices = @transform_4, window_bounds = array<i64: 1, 8>}, {pipeline_mode = #tpu.pipeline_mode<synchronous>, transform_indices = @transform_5, window_bounds = array<i64: 72, 8>}, {pipeline_mode = #tpu.pipeline_mode<synchronous>, transform_indices = @transform_6, window_bounds = array<i64: 1, 8>}, {transform_indices = @transform_7, window_bounds = array<i64: 1, 64, 8>}]} {
    %c0 = arith.constant 0 : index
    %c0_0 = arith.constant 0 : index
    %c0_1 = arith.constant 0 : index
    %c0_2 = arith.constant 0 : index
    %0 = vector.load %arg2[%c0, %c0_0, %c0_1, %c0_2] : memref<1x4x8x8xbf16, #tpu.memory_space<vmem>>, vector<1x4x8x8xbf16>
    %1 = vector.shape_cast %0 : vector<1x4x8x8xbf16> to vector<4x8x8xbf16>
    %2 = vector.shape_cast %1 : vector<4x8x8xbf16> to vector<2x2x8x8xbf16>
    %3 = arith.extf %2 : vector<2x2x8x8xbf16> to vector<2x2x8x8xf32>
    %cst = arith.constant dense<0xFF800000> : vector<2x8x8xf32>
    %4 = vector.multi_reduction <maximumf>, %3, %cst [1] : vector<2x2x8x8xf32> to vector<2x8x8xf32>
    %5 = vector.extract_strided_slice %4 {offsets = [0, 0, 0], sizes = [2, 8, 4], strides = [1, 1, 1]} : vector<2x8x8xf32> to vector<2x8x4xf32>
    %6 = vector.extract_strided_slice %4 {offsets = [0, 0, 4], sizes = [2, 8, 4], strides = [1, 1, 1]} : vector<2x8x8xf32> to vector<2x8x4xf32>
    %7 = arith.maximumf %5, %6 : vector<2x8x4xf32>
    %8 = vector.shape_cast %7 : vector<2x8x4xf32> to vector<16x4xf32>
    %c0_3 = arith.constant 0 : index
    %c0_4 = arith.constant 0 : index
    %c0_5 = arith.constant 0 : index
    %c0_6 = arith.constant 0 : index
    %9 = vector.load %arg4[%c0_3, %c0_4, %c0_5, %c0_6] : memref<1x4x8x8xbf16, #tpu.memory_space<vmem>>, vector<1x4x8x8xbf16>
    %10 = vector.shape_cast %9 : vector<1x4x8x8xbf16> to vector<4x8x8xbf16>
    %11 = vector.shape_cast %10 : vector<4x8x8xbf16> to vector<2x2x8x8xbf16>
    %12 = arith.extf %11 : vector<2x2x8x8xbf16> to vector<2x2x8x8xf32>
    %cst_7 = arith.constant dense<0xFF800000> : vector<2x8x8xf32>
    %13 = vector.multi_reduction <maximumf>, %12, %cst_7 [1] : vector<2x2x8x8xf32> to vector<2x8x8xf32>
    %14 = vector.extract_strided_slice %13 {offsets = [0, 0, 0], sizes = [2, 8, 4], strides = [1, 1, 1]} : vector<2x8x8xf32> to vector<2x8x4xf32>
    %15 = vector.extract_strided_slice %13 {offsets = [0, 0, 4], sizes = [2, 8, 4], strides = [1, 1, 1]} : vector<2x8x8xf32> to vector<2x8x4xf32>
    %16 = arith.maximumf %14, %15 : vector<2x8x4xf32>
    %17 = vector.shape_cast %16 : vector<2x8x4xf32> to vector<16x4xf32>
    %cst_8 = arith.constant 0.000000e+00 : f32
    %18 = vector.broadcast %cst_8 : f32 to vector<16x4xf32>
    %c0_i32 = arith.constant 0 : i32
    %19 = arith.cmpi sgt, %arg1, %c0_i32 : i32
    %20 = arith.extui %19 : i1 to i32
    %c0_i32_9 = arith.constant 0 : i32
    %21 = arith.cmpi ne, %20, %c0_i32_9 : i32
    scf.if %21 {
      %c8_97 = arith.constant 8 : index
      %c0_98 = arith.constant 0 : index
      %195 = vector.load %arg10[%c8_97, %c0_98] : memref<112x4xf32, #tpu.memory_space<vmem>>, vector<16x4xf32>
      tpu.vector_store %arg10[%c8_97, %c0_98], %8 {strides = array<i32>} : memref<112x4xf32, #tpu.memory_space<vmem>>, vector<16x4xf32>,
    } else {
    }
    %c0_i32_10 = arith.constant 0 : i32
    %22 = arith.cmpi eq, %arg1, %c0_i32_10 : i32
    %23 = arith.extui %22 : i1 to i32
    %c0_i32_11 = arith.constant 0 : i32
    %24 = arith.cmpi ne, %23, %c0_i32_11 : i32
    scf.if %24 {
      %c8_97 = arith.constant 8 : index
      %c0_98 = arith.constant 0 : index
      %195 = vector.load %arg10[%c8_97, %c0_98] : memref<112x4xf32, #tpu.memory_space<vmem>>, vector<16x4xf32>
      tpu.vector_store %arg10[%c8_97, %c0_98], %18 {strides = array<i32>} : memref<112x4xf32, #tpu.memory_space<vmem>>, vector<16x4xf32>,
    } else {
    }
    %c0_12 = arith.constant 0 : index
    %c0_13 = arith.constant 0 : index
    %c0_14 = arith.constant 0 : index
    %c0_15 = arith.constant 0 : index
    %25 = vector.load %arg3[%c0_12, %c0_13, %c0_14, %c0_15] : memref<1x16x8x8xbf16, #tpu.memory_space<vmem>>, vector<1x16x8x8xbf16>
    %26 = vector.shape_cast %25 : vector<1x16x8x8xbf16> to vector<16x8x8xbf16>
    %27 = vector.shape_cast %26 : vector<16x8x8xbf16> to vector<8x2x8x8xbf16>
    %28 = arith.extf %27 : vector<8x2x8x8xbf16> to vector<8x2x8x8xf32>
    %cst_16 = arith.constant dense<0xFF800000> : vector<8x8x8xf32>
    %29 = vector.multi_reduction <maximumf>, %28, %cst_16 [1] : vector<8x2x8x8xf32> to vector<8x8x8xf32>
    %30 = vector.extract_strided_slice %29 {offsets = [0, 0, 0], sizes = [8, 8, 4], strides = [1, 1, 1]} : vector<8x8x8xf32> to vector<8x8x4xf32>
    %31 = vector.extract_strided_slice %29 {offsets = [0, 0, 4], sizes = [8, 8, 4], strides = [1, 1, 1]} : vector<8x8x8xf32> to vector<8x8x4xf32>
    %32 = arith.maximumf %30, %31 : vector<8x8x4xf32>
    %33 = vector.shape_cast %32 : vector<8x8x4xf32> to vector<64x4xf32>
    %c24 = arith.constant 24 : index
    %c0_17 = arith.constant 0 : index
    %34 = vector.load %arg10[%c24, %c0_17] : memref<112x4xf32, #tpu.memory_space<vmem>>, vector<64x4xf32>
    tpu.vector_store %arg10[%c24, %c0_17], %33 {strides = array<i32>} : memref<112x4xf32, #tpu.memory_space<vmem>>, vector<64x4xf32>,
    %c0_i32_18 = arith.constant 0 : i32
    %35 = arith.cmpi slt, %arg1, %c0_i32_18 : i32
    %36 = arith.extui %35 : i1 to i32
    %c0_i32_19 = arith.constant 0 : i32
    %37 = arith.cmpi ne, %36, %c0_i32_19 : i32
    scf.if %37 {
      %c88 = arith.constant 88 : index
      %c0_97 = arith.constant 0 : index
      %195 = vector.load %arg10[%c88, %c0_97] : memref<112x4xf32, #tpu.memory_space<vmem>>, vector<16x4xf32>
      tpu.vector_store %arg10[%c88, %c0_97], %17 {strides = array<i32>} : memref<112x4xf32, #tpu.memory_space<vmem>>, vector<16x4xf32>,
    } else {
    }
    %c0_i32_20 = arith.constant 0 : i32
    %38 = arith.cmpi eq, %arg1, %c0_i32_20 : i32
    %39 = arith.extui %38 : i1 to i32
    %c0_i32_21 = arith.constant 0 : i32
    %40 = arith.cmpi ne, %39, %c0_i32_21 : i32
    scf.if %40 {
      %c88 = arith.constant 88 : index
      %c0_97 = arith.constant 0 : index
      %195 = vector.load %arg10[%c88, %c0_97] : memref<112x4xf32, #tpu.memory_space<vmem>>, vector<16x4xf32>
      tpu.vector_store %arg10[%c88, %c0_97], %18 {strides = array<i32>} : memref<112x4xf32, #tpu.memory_space<vmem>>, vector<16x4xf32>,
    } else {
    }
    %41 = tpu.iota {dimensions = array<i32: 0>} : vector<80x1xi32>
    %c8_i32 = arith.constant 8 : i32
    %c0_i32_22 = arith.constant 0 : i32
    %42 = arith.cmpi eq, %c8_i32, %c0_i32_22 : i32
    %c1_i32 = arith.constant 1 : i32
    %43 = arith.select %42, %c1_i32, %c8_i32 : i32
    %44 = vector.broadcast %43 : i32 to vector<80x1xi32>
    %45 = arith.remsi %41, %44 : vector<80x1xi32>
    %c0_i32_23 = arith.constant 0 : i32
    %46 = vector.broadcast %c0_i32_23 : i32 to vector<80x1xi32>
    %47 = arith.cmpi ne, %45, %46 : vector<80x1xi32>
    %c0_i32_24 = arith.constant 0 : i32
    %48 = vector.broadcast %c0_i32_24 : i32 to vector<80x1xi32>
    %49 = arith.cmpi slt, %45, %48 : vector<80x1xi32>
    %c0_i32_25 = arith.constant 0 : i32
    %50 = arith.cmpi slt, %43, %c0_i32_25 : i32
    %51 = vector.broadcast %50 : i1 to vector<80x1xi1>
    %52 = vector.broadcast %51 : vector<80x1xi1> to vector<80x1xi1>
    %53 = arith.xori %49, %52 : vector<80x1xi1>
    %54 = arith.andi %53, %47 : vector<80x1xi1>
    %55 = vector.broadcast %43 : i32 to vector<80x1xi32>
    %56 = arith.addi %45, %55 : vector<80x1xi32>
    %57 = arith.select %54, %56, %45 : vector<80x1xi1>, vector<80x1xi32>
    %c0_i32_26 = arith.constant 0 : i32
    %58 = vector.broadcast %c0_i32_26 : i32 to vector<80x1xi32>
    %59 = arith.cmpi ne, %57, %58 : vector<80x1xi32>
    %c7_i32 = arith.constant 7 : i32
    %60 = vector.broadcast %c7_i32 : i32 to vector<80x1xi32>
    %61 = arith.cmpi ne, %57, %60 : vector<80x1xi32>
    %c7 = arith.constant 7 : index
    %c0_27 = arith.constant 0 : index
    %62 = vector.load %arg10[%c7, %c0_27] : memref<112x4xf32, #tpu.memory_space<vmem>>, vector<80x4xf32>
    %63 = arith.truncf %62 : vector<80x4xf32> to vector<80x4xbf16>
    %cst_28 = arith.constant 0.000000e+00 : bf16
    %64 = vector.broadcast %cst_28 : bf16 to vector<80x4xbf16>
    %65 = vector.shape_cast %59 : vector<80x1xi1> to vector<80x1xi1>
    %66 = vector.broadcast %65 : vector<80x1xi1> to vector<80x4xi1>
    %67 = arith.select %66, %63, %64 : vector<80x4xi1>, vector<80x4xbf16>
    %c8 = arith.constant 8 : index
    %c0_29 = arith.constant 0 : index
    %68 = vector.load %arg10[%c8, %c0_29] : memref<112x4xf32, #tpu.memory_space<vmem>>, vector<80x4xf32>
    %69 = arith.truncf %68 : vector<80x4xf32> to vector<80x4xbf16>
    %c9 = arith.constant 9 : index
    %c0_30 = arith.constant 0 : index
    %70 = vector.load %arg10[%c9, %c0_30] : memref<112x4xf32, #tpu.memory_space<vmem>>, vector<80x4xf32>
    %71 = arith.truncf %70 : vector<80x4xf32> to vector<80x4xbf16>
    %cst_31 = arith.constant 0.000000e+00 : bf16
    %72 = vector.broadcast %cst_31 : bf16 to vector<80x4xbf16>
    %73 = vector.shape_cast %61 : vector<80x1xi1> to vector<80x1xi1>
    %74 = vector.broadcast %73 : vector<80x1xi1> to vector<80x4xi1>
    %75 = arith.select %74, %71, %72 : vector<80x4xi1>, vector<80x4xbf16>
    %c15 = arith.constant 15 : index
    %c0_32 = arith.constant 0 : index
    %76 = vector.load %arg10[%c15, %c0_32] : memref<112x4xf32, #tpu.memory_space<vmem>>, vector<80x4xf32>
    %77 = arith.truncf %76 : vector<80x4xf32> to vector<80x4xbf16>
    %cst_33 = arith.constant 0.000000e+00 : bf16
    %78 = vector.broadcast %cst_33 : bf16 to vector<80x4xbf16>
    %79 = vector.shape_cast %59 : vector<80x1xi1> to vector<80x1xi1>
    %80 = vector.broadcast %79 : vector<80x1xi1> to vector<80x4xi1>
    %81 = arith.select %80, %77, %78 : vector<80x4xi1>, vector<80x4xbf16>
    %c16 = arith.constant 16 : index
    %c0_34 = arith.constant 0 : index
    %82 = vector.load %arg10[%c16, %c0_34] : memref<112x4xf32, #tpu.memory_space<vmem>>, vector<80x4xf32>
    %83 = arith.truncf %82 : vector<80x4xf32> to vector<80x4xbf16>
    %c17 = arith.constant 17 : index
    %c0_35 = arith.constant 0 : index
    %84 = vector.load %arg10[%c17, %c0_35] : memref<112x4xf32, #tpu.memory_space<vmem>>, vector<80x4xf32>
    %85 = arith.truncf %84 : vector<80x4xf32> to vector<80x4xbf16>
    %cst_36 = arith.constant 0.000000e+00 : bf16
    %86 = vector.broadcast %cst_36 : bf16 to vector<80x4xbf16>
    %87 = vector.shape_cast %61 : vector<80x1xi1> to vector<80x1xi1>
    %88 = vector.broadcast %87 : vector<80x1xi1> to vector<80x4xi1>
    %89 = arith.select %88, %85, %86 : vector<80x4xi1>, vector<80x4xbf16>
    %c23 = arith.constant 23 : index
    %c0_37 = arith.constant 0 : index
    %90 = vector.load %arg10[%c23, %c0_37] : memref<112x4xf32, #tpu.memory_space<vmem>>, vector<80x4xf32>
    %91 = arith.truncf %90 : vector<80x4xf32> to vector<80x4xbf16>
    %cst_38 = arith.constant 0.000000e+00 : bf16
    %92 = vector.broadcast %cst_38 : bf16 to vector<80x4xbf16>
    %93 = vector.shape_cast %59 : vector<80x1xi1> to vector<80x1xi1>
    %94 = vector.broadcast %93 : vector<80x1xi1> to vector<80x4xi1>
    %95 = arith.select %94, %91, %92 : vector<80x4xi1>, vector<80x4xbf16>
    %c24_39 = arith.constant 24 : index
    %c0_40 = arith.constant 0 : index
    %96 = vector.load %arg10[%c24_39, %c0_40] : memref<112x4xf32, #tpu.memory_space<vmem>>, vector<80x4xf32>
    %97 = arith.truncf %96 : vector<80x4xf32> to vector<80x4xbf16>
    %c25 = arith.constant 25 : index
    %c0_41 = arith.constant 0 : index
    %98 = vector.load %arg10[%c25, %c0_41] : memref<112x4xf32, #tpu.memory_space<vmem>>, vector<80x4xf32>
    %99 = arith.truncf %98 : vector<80x4xf32> to vector<80x4xbf16>
    %cst_42 = arith.constant 0.000000e+00 : bf16
    %100 = vector.broadcast %cst_42 : bf16 to vector<80x4xbf16>
    %101 = vector.shape_cast %61 : vector<80x1xi1> to vector<80x1xi1>
    %102 = vector.broadcast %101 : vector<80x1xi1> to vector<80x4xi1>
    %103 = arith.select %102, %99, %100 : vector<80x4xi1>, vector<80x4xbf16>
    %104 = tpu.concatenate %67, %69, %75, %81, %83, %89, %95, %97, %103 in 1 : vector<80x4xbf16>, vector<80x4xbf16>, vector<80x4xbf16>, vector<80x4xbf16>, vector<80x4xbf16>, vector<80x4xbf16>, vector<80x4xbf16>, vector<80x4xbf16>, vector<80x4xbf16> -> vector<80x36xbf16>
    %c0_43 = arith.constant 0 : index
    %c0_44 = arith.constant 0 : index
    %105 = vector.load %arg5[%c0_43, %c0_44] : memref<36x8xbf16, #tpu.memory_space<vmem>>, vector<36x8xbf16>
    %cst_45 = arith.constant dense<0.000000e+00> : vector<80x8xf32>
    %106 = tpu.matmul %104, %105, %cst_45 {dimension_numbers = #tpu.dot_dimension_numbers<[1], [0], [0], [1], [0, 0, 1, 1], [], []>} : vector<80x36xbf16>, vector<36x8xbf16>, vector<80x8xf32> -> vector<80x8xf32>
    %c0_46 = arith.constant 0 : index
    %c0_47 = arith.constant 0 : index
    %107 = vector.load %arg6[%c0_46, %c0_47] : memref<1x8xf32, #tpu.memory_space<vmem>>, vector<1x8xf32>
    %108 = vector.broadcast %107 : vector<1x8xf32> to vector<80x8xf32>
    %109 = arith.addf %106, %108 : vector<80x8xf32>
    %cst_48 = arith.constant 0.000000e+00 : f32
    %110 = vector.broadcast %cst_48 : f32 to vector<80x8xf32>
    %111 = arith.maximumf %109, %110 : vector<80x8xf32>
    %c8_49 = arith.constant 8 : index
    %c0_50 = arith.constant 0 : index
    %112 = vector.load %arg11[%c8_49, %c0_50] : memref<96x8xf32, #tpu.memory_space<vmem>>, vector<80x8xf32>
    tpu.vector_store %arg11[%c8_49, %c0_50], %111 {strides = array<i32>} : memref<96x8xf32, #tpu.memory_space<vmem>>, vector<80x8xf32>,
    %cst_51 = arith.constant 0.000000e+00 : f32
    %113 = vector.broadcast %cst_51 : f32 to vector<8x8xf32>
    %c0_i32_52 = arith.constant 0 : i32
    %114 = arith.cmpi eq, %arg1, %c0_i32_52 : i32
    %115 = arith.extui %114 : i1 to i32
    %c0_i32_53 = arith.constant 0 : i32
    %116 = arith.cmpi ne, %115, %c0_i32_53 : i32
    scf.if %116 {
      %c8_97 = arith.constant 8 : index
      %c0_98 = arith.constant 0 : index
      %195 = vector.load %arg11[%c8_97, %c0_98] : memref<96x8xf32, #tpu.memory_space<vmem>>, vector<8x8xf32>
      tpu.vector_store %arg11[%c8_97, %c0_98], %113 {strides = array<i32>} : memref<96x8xf32, #tpu.memory_space<vmem>>, vector<8x8xf32>,
    } else {
    }
    %c0_i32_54 = arith.constant 0 : i32
    %117 = arith.cmpi eq, %arg1, %c0_i32_54 : i32
    %118 = arith.extui %117 : i1 to i32
    %c0_i32_55 = arith.constant 0 : i32
    %119 = arith.cmpi ne, %118, %c0_i32_55 : i32
    scf.if %119 {
      %c80 = arith.constant 80 : index
      %c0_97 = arith.constant 0 : index
      %195 = vector.load %arg11[%c80, %c0_97] : memref<96x8xf32, #tpu.memory_space<vmem>>, vector<8x8xf32>
      tpu.vector_store %arg11[%c80, %c0_97], %113 {strides = array<i32>} : memref<96x8xf32, #tpu.memory_space<vmem>>, vector<8x8xf32>,
    } else {
    }
    %120 = tpu.iota {dimensions = array<i32: 0>} : vector<64x1xi32>
    %c8_i32_56 = arith.constant 8 : i32
    %c0_i32_57 = arith.constant 0 : i32
    %121 = arith.cmpi eq, %c8_i32_56, %c0_i32_57 : i32
    %c1_i32_58 = arith.constant 1 : i32
    %122 = arith.select %121, %c1_i32_58, %c8_i32_56 : i32
    %123 = vector.broadcast %122 : i32 to vector<64x1xi32>
    %124 = arith.remsi %120, %123 : vector<64x1xi32>
    %c0_i32_59 = arith.constant 0 : i32
    %125 = vector.broadcast %c0_i32_59 : i32 to vector<64x1xi32>
    %126 = arith.cmpi ne, %124, %125 : vector<64x1xi32>
    %c0_i32_60 = arith.constant 0 : i32
    %127 = vector.broadcast %c0_i32_60 : i32 to vector<64x1xi32>
    %128 = arith.cmpi slt, %124, %127 : vector<64x1xi32>
    %c0_i32_61 = arith.constant 0 : i32
    %129 = arith.cmpi slt, %122, %c0_i32_61 : i32
    %130 = vector.broadcast %129 : i1 to vector<64x1xi1>
    %131 = vector.broadcast %130 : vector<64x1xi1> to vector<64x1xi1>
    %132 = arith.xori %128, %131 : vector<64x1xi1>
    %133 = arith.andi %132, %126 : vector<64x1xi1>
    %134 = vector.broadcast %122 : i32 to vector<64x1xi32>
    %135 = arith.addi %124, %134 : vector<64x1xi32>
    %136 = arith.select %133, %135, %124 : vector<64x1xi1>, vector<64x1xi32>
    %c0_i32_62 = arith.constant 0 : i32
    %137 = vector.broadcast %c0_i32_62 : i32 to vector<64x1xi32>
    %138 = arith.cmpi ne, %136, %137 : vector<64x1xi32>
    %c7_i32_63 = arith.constant 7 : i32
    %139 = vector.broadcast %c7_i32_63 : i32 to vector<64x1xi32>
    %140 = arith.cmpi ne, %136, %139 : vector<64x1xi32>
    %c7_64 = arith.constant 7 : index
    %c0_65 = arith.constant 0 : index
    %141 = vector.load %arg11[%c7_64, %c0_65] : memref<96x8xf32, #tpu.memory_space<vmem>>, vector<64x8xf32>
    %142 = arith.truncf %141 : vector<64x8xf32> to vector<64x8xbf16>
    %cst_66 = arith.constant 0.000000e+00 : bf16
    %143 = vector.broadcast %cst_66 : bf16 to vector<64x8xbf16>
    %144 = vector.shape_cast %138 : vector<64x1xi1> to vector<64x1xi1>
    %145 = vector.broadcast %144 : vector<64x1xi1> to vector<64x8xi1>
    %146 = arith.select %145, %142, %143 : vector<64x8xi1>, vector<64x8xbf16>
    %c8_67 = arith.constant 8 : index
    %c0_68 = arith.constant 0 : index
    %147 = vector.load %arg11[%c8_67, %c0_68] : memref<96x8xf32, #tpu.memory_space<vmem>>, vector<64x8xf32>
    %148 = arith.truncf %147 : vector<64x8xf32> to vector<64x8xbf16>
    %c9_69 = arith.constant 9 : index
    %c0_70 = arith.constant 0 : index
    %149 = vector.load %arg11[%c9_69, %c0_70] : memref<96x8xf32, #tpu.memory_space<vmem>>, vector<64x8xf32>
    %150 = arith.truncf %149 : vector<64x8xf32> to vector<64x8xbf16>
    %cst_71 = arith.constant 0.000000e+00 : bf16
    %151 = vector.broadcast %cst_71 : bf16 to vector<64x8xbf16>
    %152 = vector.shape_cast %140 : vector<64x1xi1> to vector<64x1xi1>
    %153 = vector.broadcast %152 : vector<64x1xi1> to vector<64x8xi1>
    %154 = arith.select %153, %150, %151 : vector<64x8xi1>, vector<64x8xbf16>
    %c15_72 = arith.constant 15 : index
    %c0_73 = arith.constant 0 : index
    %155 = vector.load %arg11[%c15_72, %c0_73] : memref<96x8xf32, #tpu.memory_space<vmem>>, vector<64x8xf32>
    %156 = arith.truncf %155 : vector<64x8xf32> to vector<64x8xbf16>
    %cst_74 = arith.constant 0.000000e+00 : bf16
    %157 = vector.broadcast %cst_74 : bf16 to vector<64x8xbf16>
    %158 = vector.shape_cast %138 : vector<64x1xi1> to vector<64x1xi1>
    %159 = vector.broadcast %158 : vector<64x1xi1> to vector<64x8xi1>
    %160 = arith.select %159, %156, %157 : vector<64x8xi1>, vector<64x8xbf16>
    %c16_75 = arith.constant 16 : index
    %c0_76 = arith.constant 0 : index
    %161 = vector.load %arg11[%c16_75, %c0_76] : memref<96x8xf32, #tpu.memory_space<vmem>>, vector<64x8xf32>
    %162 = arith.truncf %161 : vector<64x8xf32> to vector<64x8xbf16>
    %c17_77 = arith.constant 17 : index
    %c0_78 = arith.constant 0 : index
    %163 = vector.load %arg11[%c17_77, %c0_78] : memref<96x8xf32, #tpu.memory_space<vmem>>, vector<64x8xf32>
    %164 = arith.truncf %163 : vector<64x8xf32> to vector<64x8xbf16>
    %cst_79 = arith.constant 0.000000e+00 : bf16
    %165 = vector.broadcast %cst_79 : bf16 to vector<64x8xbf16>
    %166 = vector.shape_cast %140 : vector<64x1xi1> to vector<64x1xi1>
    %167 = vector.broadcast %166 : vector<64x1xi1> to vector<64x8xi1>
    %168 = arith.select %167, %164, %165 : vector<64x8xi1>, vector<64x8xbf16>
    %c23_80 = arith.constant 23 : index
    %c0_81 = arith.constant 0 : index
    %169 = vector.load %arg11[%c23_80, %c0_81] : memref<96x8xf32, #tpu.memory_space<vmem>>, vector<64x8xf32>
    %170 = arith.truncf %169 : vector<64x8xf32> to vector<64x8xbf16>
    %cst_82 = arith.constant 0.000000e+00 : bf16
    %171 = vector.broadcast %cst_82 : bf16 to vector<64x8xbf16>
    %172 = vector.shape_cast %138 : vector<64x1xi1> to vector<64x1xi1>
    %173 = vector.broadcast %172 : vector<64x1xi1> to vector<64x8xi1>
    %174 = arith.select %173, %170, %171 : vector<64x8xi1>, vector<64x8xbf16>
    %c24_83 = arith.constant 24 : index
    %c0_84 = arith.constant 0 : index
    %175 = vector.load %arg11[%c24_83, %c0_84] : memref<96x8xf32, #tpu.memory_space<vmem>>, vector<64x8xf32>
    %176 = arith.truncf %175 : vector<64x8xf32> to vector<64x8xbf16>
    %c25_85 = arith.constant 25 : index
    %c0_86 = arith.constant 0 : index
    %177 = vector.load %arg11[%c25_85, %c0_86] : memref<96x8xf32, #tpu.memory_space<vmem>>, vector<64x8xf32>
    %178 = arith.truncf %177 : vector<64x8xf32> to vector<64x8xbf16>
    %cst_87 = arith.constant 0.000000e+00 : bf16
    %179 = vector.broadcast %cst_87 : bf16 to vector<64x8xbf16>
    %180 = vector.shape_cast %140 : vector<64x1xi1> to vector<64x1xi1>
    %181 = vector.broadcast %180 : vector<64x1xi1> to vector<64x8xi1>
    %182 = arith.select %181, %178, %179 : vector<64x8xi1>, vector<64x8xbf16>
    %183 = tpu.concatenate %146, %148, %154, %160, %162, %168, %174, %176, %182 in 1 : vector<64x8xbf16>, vector<64x8xbf16>, vector<64x8xbf16>, vector<64x8xbf16>, vector<64x8xbf16>, vector<64x8xbf16>, vector<64x8xbf16>, vector<64x8xbf16>, vector<64x8xbf16> -> vector<64x72xbf16>
    %c0_88 = arith.constant 0 : index
    %c0_89 = arith.constant 0 : index
    %184 = vector.load %arg7[%c0_88, %c0_89] : memref<72x8xbf16, #tpu.memory_space<vmem>>, vector<72x8xbf16>
    %cst_90 = arith.constant dense<0.000000e+00> : vector<64x8xf32>
    %185 = tpu.matmul %183, %184, %cst_90 {dimension_numbers = #tpu.dot_dimension_numbers<[1], [0], [0], [1], [0, 0, 1, 1], [], []>} : vector<64x72xbf16>, vector<72x8xbf16>, vector<64x8xf32> -> vector<64x8xf32>
    %c0_91 = arith.constant 0 : index
    %c0_92 = arith.constant 0 : index
    %186 = vector.load %arg8[%c0_91, %c0_92] : memref<1x8xf32, #tpu.memory_space<vmem>>, vector<1x8xf32>
    %187 = vector.broadcast %186 : vector<1x8xf32> to vector<64x8xf32>
    %188 = arith.addf %185, %187 : vector<64x8xf32>
    %cst_93 = arith.constant 0.000000e+00 : f32
    %189 = vector.broadcast %cst_93 : f32 to vector<64x8xf32>
    %190 = arith.maximumf %188, %189 : vector<64x8xf32>
    %191 = arith.truncf %190 : vector<64x8xf32> to vector<64x8xbf16>
    %c0_94 = arith.constant 0 : index
    %c0_95 = arith.constant 0 : index
    %c0_96 = arith.constant 0 : index
    %192 = vector.load %arg9[%c0_94, %c0_95, %c0_96] : memref<1x64x8xbf16, #tpu.memory_space<vmem>>, vector<1x64x8xbf16>
    %193 = vector.shape_cast %192 : vector<1x64x8xbf16> to vector<64x8xbf16>
    %194 = vector.shape_cast %191 : vector<64x8xbf16> to vector<1x64x8xbf16>
    tpu.vector_store %arg9[%c0_94, %c0_95, %c0_96], %194 {strides = array<i32>} : memref<1x64x8xbf16, #tpu.memory_space<vmem>>, vector<1x64x8xbf16>,
    return
  }
  func.func @transform_0(%arg0: i32, %arg1: i32) -> (i32, i32, i32, i32) {
    %c4_i32 = arith.constant 4 : i32
    %0 = arith.muli %arg1, %c4_i32 : i32
    %c1_i32 = arith.constant 1 : i32
    %1 = arith.subi %0, %c1_i32 : i32
    %c0_i32 = arith.constant 0 : i32
    %2 = arith.maxsi %1, %c0_i32 : i32
    %c0_i32_0 = arith.constant 0 : i32
    %c0_i32_1 = arith.constant 0 : i32
    %c0_i32_2 = arith.constant 0 : i32
    return %arg0, %2, %c0_i32_0, %c0_i32_1 : i32, i32, i32, i32
  }
  func.func @transform_1(%arg0: i32, %arg1: i32) -> (i32, i32, i32, i32) {
    %c0_i32 = arith.constant 0 : i32
    %c0_i32_0 = arith.constant 0 : i32
    %c0_i32_1 = arith.constant 0 : i32
    return %arg0, %arg1, %c0_i32, %c0_i32_0 : i32, i32, i32, i32
  }
  func.func @transform_2(%arg0: i32, %arg1: i32) -> (i32, i32, i32, i32) {
    %c1_i32 = arith.constant 1 : i32
    %0 = arith.addi %arg1, %c1_i32 : i32
    %c4_i32 = arith.constant 4 : i32
    %1 = arith.muli %0, %c4_i32 : i32
    %c3_i32 = arith.constant 3 : i32
    %2 = arith.minsi %1, %c3_i32 : i32
    %c0_i32 = arith.constant 0 : i32
    %c0_i32_0 = arith.constant 0 : i32
    %c0_i32_1 = arith.constant 0 : i32
    return %arg0, %2, %c0_i32, %c0_i32_0 : i32, i32, i32, i32
  }
  func.func @transform_3(%arg0: i32, %arg1: i32) -> (i32, i32) {
    %c0_i32 = arith.constant 0 : i32
    %c0_i32_0 = arith.constant 0 : i32
    %c0_i32_1 = arith.constant 0 : i32
    return %c0_i32, %c0_i32_0 : i32, i32
  }
  func.func @transform_4(%arg0: i32, %arg1: i32) -> (i32, i32) {
    %c0_i32 = arith.constant 0 : i32
    %c0_i32_0 = arith.constant 0 : i32
    %c0_i32_1 = arith.constant 0 : i32
    return %c0_i32, %c0_i32_0 : i32, i32
  }
  func.func @transform_5(%arg0: i32, %arg1: i32) -> (i32, i32) {
    %c0_i32 = arith.constant 0 : i32
    %c0_i32_0 = arith.constant 0 : i32
    %c0_i32_1 = arith.constant 0 : i32
    return %c0_i32, %c0_i32_0 : i32, i32
  }
  func.func @transform_6(%arg0: i32, %arg1: i32) -> (i32, i32) {
    %c0_i32 = arith.constant 0 : i32
    %c0_i32_0 = arith.constant 0 : i32
    %c0_i32_1 = arith.constant 0 : i32
    return %c0_i32, %c0_i32_0 : i32, i32
  }
  func.func @transform_7(%arg0: i32, %arg1: i32) -> (i32, i32, i32) {
    %c0_i32 = arith.constant 0 : i32
    %c0_i32_0 = arith.constant 0 : i32
    return %arg0, %arg1, %c0_i32 : i32, i32, i32
  }
}

</mosaic_0001>

<bundles_post_ra>
// kernel: down_forward.1
= control target key start
LH: loop header
LB: loop body
LE: loop exit
PB: predicated region body
PF: predicated region fallthrough
CT: control target
= control target key end

     0   :  { %s2309_s23 = smov 0   ;;  %s2311_s24 = smov 0   ;;  %s3305_s0 = inlined_call_operand.vmem [shape: bf16[2,16,8,8], index: 0, kind: input, shape index: {}, may-alias: {0,1,2}]   ;;  %s3306_s1 = inlined_call_operand.vmem [shape: bf16[2,16,8,8], index: 1, kind: input, shape index: {}, may-alias: {0,1,2}]   ;;  %s3307_s2 = inlined_call_operand.vmem [shape: bf16[2,16,8,8], index: 2, kind: input, shape index: {}, may-alias: {0,1,2}]   ;;  %s3308_s3 = inlined_call_operand.vmem [shape: bf16[36,8], index: 3, kind: input, shape index: {}]   ;;  %s3309_s4 = inlined_call_operand.vmem [shape: f32[1,8], index: 4, kind: input, shape index: {}]   ;;  %s3310_s5 = inlined_call_operand.vmem [shape: bf16[72,8], index: 5, kind: input, shape index: {}]   ;;  %s3311_s6 = inlined_call_operand.vmem [shape: f32[1,8], index: 6, kind: input, shape index: {}]   ;;  %s3312_s7 = inlined_call_operand.vmem [shape: bf16[2,64,8], index: 7, kind: output, shape index: {}]  }
   0x1   :  { %s2313_s2 = smov 0  }
   0x2 LB: > { %s29_s25 = sadd.s32 1, %s2249_s24  ;;  %p2050_p0 = scmp.ge.s32.totalorder %s2253_s2, 1  ;;  %s2253_s2 = sphi %s2313_s2, %s17_s2   ;;  %s2249_s24 = sphi %s2311_s24, %s3461_s24   ;;  %s2245_s23 = sphi %s2309_s23, %s3460_s23  }
   0x3   : > { %p31_p1 = scmp.ge.s32.totalorder %s29_s25, 2  ;;  %p324_p2 = scmp.lt.s32.totalorder %s2253_s2, 3 }
   0x5   : > { %s3463_s25 = smov (%p31_p1, %s29_s25), 0  ;;  %p325_p3 = pnand %p2050_p0, %p324_p2 }
   0x6   : > { %p395_p4 = scmp.lt.s32.totalorder (!%p325_p3), %s2245_s23, 1  ;;  %s2255_s30 = smov (!%p325_p3), 124  }
   0x7   : > { %328 = sbr.rel (%p325_p3) target bundleno = 845 (0x34d), region = 48  ;;  %s2257_s8 = smov (!%p325_p3), 4  }
   0x8   : > { %s2258_s9 = smov (!%p325_p3), 16   ;;  %s2259_s10 = smov (!%p325_p3), 28  }
   0x9   : > { %s2260_s11 = smov (!%p325_p3), 8   ;;  %s2261_s12 = smov (!%p325_p3), 20  }
   0xa   : > { %s2262_s13 = smov (!%p325_p3), 12   ;;  %s2263_s14 = smov (!%p325_p3), 32  }
   0xb   : > { %s2264_s15 = smov (!%p325_p3), 24   ;;  %s2266_s27 = smov (!%p325_p3), 64  }
   0xc   : > { %s3465_s23 = smov (!%p395_p4, %s2245_s23), 1  ;;  %vm3313_vm0 = vcmask 64512   ;;  %vm3314_vm1 = vcmask 31744   ;;  %v3319_v52 = vmov 0.0   ;;  %s2267_s28 = smov 40  }
   0xd   : > { %s2094_s26 = sshll.u32 %s3465_s23, 6  ;;  %508 = vst.msk [vmem:[#allocation2 + $0x8] sm:$0xff] %vm3314_vm1, %v3319_v52  ;;  %s2098_s19 = sshll.u32 %s3465_s23, 5 }
   0xe   : > { %s416_s29 = scalar_lea.vmem %s3306_s1, %s2094_s26  ;;  %509 = vst.msk [vmem:[#allocation2 + $0x10] sm:$0xff] %vm3314_vm1, %v3319_v52  ;;  %s2265_s26 = smov 56  }
   0xf   : > { %v2159_v0 = vld [vmem:[%s416_s29 + $0x20] sm:$0xff]   ;;  %v2160_v1 = vld [vmem:[%s416_s29 + $0x28] sm:$0xff]   ;;  %v2161_v12 = vld [vmem:[%s416_s29 + $0x30] sm:$0xff]   ;;  %624 = vst.msk [vmem:[#allocation2 + $0x58] sm:$0xff] %vm3314_vm1, %v3319_v52  ;;  %s3278_s22 = scalar_lea.vmem %s3312_s7, %s2098_s19 }
  0x10   : > { %v2122_v2 = vld [vmem:[%s416_s29] sm:$0xff]   ;;  %v2139_v3 = vunpack.c.l.bf16 %v2159_v0  ;;  %v2140_v4 = vunpack.c.h.bf16 %v2159_v0  ;;  %v2143_v5 = vunpack.c.l.bf16 %v2160_v1  ;;  %v2144_v6 = vunpack.c.h.bf16 %v2160_v1  ;;  %v2156_v7 = vld [vmem:[%s416_s29 + $0x8] sm:$0xff]   ;;  %v2162_v17 = vld [vmem:[%s416_s29 + $0x38] sm:$0xff]   ;;  %625 = vst.msk [vmem:[#allocation2 + $0x60] sm:$0xff] %vm3314_vm1, %v3319_v52 }
  0x11   : > { %v2123_v8 = vunpack.c.l.bf16 %v2122_v2  ;;  %v2124_v9 = vunpack.c.h.bf16 %v2122_v2  ;;  %v2127_v10 = vunpack.c.l.bf16 %v2156_v7  ;;  %v2128_v11 = vunpack.c.h.bf16 %v2156_v7  ;;  %v2157_v22 = vld [vmem:[%s416_s29 + $0x10] sm:$0xff]   ;;  %v2158_v27 = vld [vmem:[%s416_s29 + $0x18] sm:$0xff]   ;;  %s2268_s29 = smov 48  }
  0x12   : > { %v554_v13 = vsel %vm3313_vm0, %v2139_v3, -inf  ;;  %v555_v14 = vsel %vm3313_vm0, %v2140_v4, -inf  ;;  %v557_v15 = vsel %vm3313_vm0, %v2143_v5, -inf  ;;  %v558_v16 = vsel %vm3313_vm0, %v2144_v6, -inf }
  0x13   : > { %v556_v18 = vmax.f32 %v554_v13, %v555_v14  ;;  %v559_v19 = vmax.f32 %v557_v15, %v558_v16  ;;  %v542_v20 = vsel %vm3313_vm0, %v2123_v8, -inf  ;;  %v543_v21 = vsel %vm3313_vm0, %v2124_v9, -inf }
  0x14   : > { %v544_v23 = vmax.f32 %v542_v20, %v543_v21  ;;  %v545_v24 = vsel %vm3313_vm0, %v2127_v10, -inf  ;;  %v546_v25 = vsel %vm3313_vm0, %v2128_v11, -inf  ;;  %v2147_v26 = vunpack.c.l.bf16 %v2161_v12  ;;  %v837_v53 = vld [vmem:[#allocation2 + $0x8] sm:$0xff] }
  0x15   : > { %v2219_v28 = vpack.i.bf16 %v559_v19, %v556_v18  ;;  %v547_v29 = vmax.f32 %v545_v24, %v546_v25  ;;  %v2148_v30 = vunpack.c.h.bf16 %v2161_v12  ;;  %v2151_v31 = vunpack.c.l.bf16 %v2162_v17  ;;  %v838_v54 = vld [vmem:[#allocation2 + $0x10] sm:$0xff] }
  0x16   : > { %v2152_v32 = vunpack.c.h.bf16 %v2162_v17  ;;  %v560_v33 = vsel %vm3313_vm0, %v2147_v26, -inf  ;;  %v2131_v34 = vunpack.c.l.bf16 %v2157_v22  ;;  %v2132_v35 = vunpack.c.h.bf16 %v2157_v22 }
  0x17   : > { %2220 = vrot.lane.b32.xlu1 %v2219_v28, %s2255_s30  ;;  %v2209_v36 = vpack.i.bf16 %v547_v29, %v544_v23  ;;  %v561_v37 = vsel %vm3313_vm0, %v2148_v30, -inf  ;;  %v563_v38 = vsel %vm3313_vm0, %v2151_v31, -inf  ;;  %v2135_v39 = vunpack.c.l.bf16 %v2158_v27 }
  0x18   : > { %v562_v40 = vmax.f32 %v560_v33, %v561_v37  ;;  %v564_v41 = vsel %vm3313_vm0, %v2152_v32, -inf  ;;  %v2136_v42 = vunpack.c.h.bf16 %v2158_v27  ;;  %v548_v43 = vsel %vm3313_vm0, %v2131_v34, -inf }
  0x19   : > { %2210 = vrot.lane.b32.xlu0 %v2209_v36, %s2255_s30  ;;  %v565_v44 = vmax.f32 %v563_v38, %v564_v41  ;;  %v549_v45 = vsel %vm3313_vm0, %v2132_v35, -inf  ;;  %v551_v46 = vsel %vm3313_vm0, %v2135_v39, -inf  ;;  %v847_v55 = vpack.c.bf16 %v837_v53, %v837_v53 }
  0x1a   : > { %v550_v47 = vmax.f32 %v548_v43, %v549_v45  ;;  %v552_v48 = vsel %vm3313_vm0, %v2136_v42, -inf  ;;  %v848_v56 = vpack.c.bf16 %v838_v54, %v838_v54  ;;  %v3340_v54 = vmov 0 }
  0x1b   : > { %v2224_v49 = vpack.i.bf16 %v565_v44, %v562_v40  ;;  %v553_v50 = vmax.f32 %v551_v46, %v552_v48  ;;  %v1004_v57 = vunpack.c.l.b16 %v847_v55 }
  0x1c   : > { %v1005_v58 = vunpack.c.l.b16 %v848_v56 }
  0x1d   : > { %v2214_v51 = vpack.i.bf16 %v553_v50, %v550_v47 }
  0x1e   : > { %v1014_v59 = vpack.c.b16 %v1005_v58, %v1004_v57  ;;  %v3342_v57 = vmov 0 }
  0x1f   : > { %2225 = vrot.lane.b32.xlu1 %v2224_v49, %s2255_s30  ;;  %v857_v49 = vld [vmem:[#allocation2 + $0x9] sm:$0xff] }
  0x20   : > { %1019 = vrot.lane.b32.xlu2 %v1014_v59, %s2257_s8 }
  0x21   : > { %2215 = vrot.lane.b32.xlu0 %v2214_v51, %s2255_s30  ;;  %v867_v51 = vpack.c.bf16 %v857_v49, %v857_v49 }
  0x89   : > { %v2221_v60 = vpop.permute.xlu1 %2220 }
  0x8a   : > { %v2223_v61 = vunpack.i.h.bf16 %v2221_v60  ;;  %v2222_v62 = vunpack.i.l.bf16 %v2221_v60 }
  0x8b   : > { %v2211_v63 = vpop.permute.xlu0 %2210 }
  0x8c   : > { %v603_v0 = vmax.f32 %v559_v19, %v2223_v61  ;;  %v602_v1 = vmax.f32 %v556_v18, %v2222_v62  ;;  %v2213_v2 = vunpack.i.h.bf16 %v2211_v63  ;;  %v2212_v3 = vunpack.i.l.bf16 %v2211_v63 }
  0x8d   : > { %v626_v19 = vlaneseq }
  0x8e   : > { %612 = vst.msk [vmem:[#allocation2 + $0x40] sm:$0xff] %vm3314_vm1, %v603_v0  ;;  %v599_v4 = vmax.f32 %v547_v29, %v2213_v2  ;;  %v598_v5 = vmax.f32 %v544_v23, %v2212_v3 }
  0x8f   : > { %611 = vst.msk [vmem:[#allocation2 + $0x38] sm:$0xff] %vm3314_vm1, %v602_v1  ;;  %v2368_v28 = vshrl.u32 %v626_v19, 7 }
  0x90   : > { %608 = vst.msk [vmem:[#allocation2 + $0x20] sm:$0xff] %vm3314_vm1, %v599_v4 }
  0x91   : > { %607 = vst.msk [vmem:[#allocation2 + $0x18] sm:$0xff] %vm3314_vm1, %v598_v5  ;;  %v2226_v6 = vpop.permute.xlu1 %2225  ;;  %v628_v35 = vadd.s32 8, %v2368_v28  ;;  %v641_v41 = vand.u32 7, %v2368_v28  ;;  %v629_v59 = vadd.s32 16, %v2368_v28  ;;  %v630_v2 = vadd.s32 24, %v2368_v28 }
  0x92   : > { %v2228_v7 = vunpack.i.h.bf16 %v2226_v6  ;;  %v2227_v8 = vunpack.i.l.bf16 %v2226_v6 }
  0x93   : > { %v2216_v9 = vpop.permute.xlu0 %2215  ;;  %v648_v43 = vand.u32 7, %v628_v35  ;;  %vm767_vm2 = vcmp.ne.s32.totalorder %v641_v41, 7  ;;  %vm757_vm6 = vcmp.ne.s32.totalorder %v641_v41, 0  ;;  %v655_v3 = vand.u32 7, %v629_v59 }
  0x94   : > { %v605_v10 = vmax.f32 %v565_v44, %v2228_v7  ;;  %v604_v11 = vmax.f32 %v562_v40, %v2227_v8  ;;  %v2218_v12 = vunpack.i.h.bf16 %v2216_v9  ;;  %v2217_v13 = vunpack.i.l.bf16 %v2216_v9  ;;  %vm2384_vm4 = vmpackc.low %vm767_vm2, %vm767_vm2 }
  0x95   : > { %v844_v14 = vld [vmem:[#allocation2 + $0x40] sm:$0xff]  ;;  %vm768_vm3 = vcmp.ne.s32.totalorder %v648_v43, 7  ;;  %v3341_v54 = vsel %vm2384_vm4, 4294967295, %v3340_v54  ;;  %v907_v60 = vsel %vm2384_vm4, %v867_v51, 0  ;;  %vm2401_vm7 = vmpackc.low %vm757_vm6, %vm757_vm6  ;;  %vm758_vm8 = vcmp.ne.s32.totalorder %v648_v43, 0 }
  0x96   : > { %614 = vst.msk [vmem:[#allocation2 + $0x50] sm:$0xff] %vm3314_vm1, %v605_v10  ;;  %v601_v15 = vmax.f32 %v553_v50, %v2218_v12  ;;  %v600_v16 = vmax.f32 %v550_v47, %v2217_v13  ;;  %v843_v17 = vld [vmem:[#allocation2 + $0x38] sm:$0xff]  ;;  %v854_v18 = vpack.c.bf16 %v844_v14, %v844_v14  ;;  %vm2389_vm5 = vmpackc.low %vm768_vm3, %vm768_vm3  ;;  %v1039_v4 = vunpack.c.l.b16 %v907_v60 }
  0x97   : > { %613 = vst.msk [vmem:[#allocation2 + $0x48] sm:$0xff] %vm3314_vm1, %v604_v11  ;;  %v853_v20 = vpack.c.bf16 %v843_v17, %v843_v17  ;;  %v840_v21 = vld [vmem:[#allocation2 + $0x20] sm:$0xff]  ;;  %v3343_v57 = vsel %vm2389_vm5, 4294967295, %v3342_v57  ;;  %v2414_v10 = vadd.s32 48, %v2368_v28  ;;  %v2417_v11 = vadd.s32 32, %v2368_v28  ;;  %vm2430_vm10 = vmpackc.low %vm758_vm8, %vm758_vm8 }
  0x98   : > { %610 = vst.msk [vmem:[#allocation2 + $0x30] sm:$0xff] %vm3314_vm1, %v601_v15  ;;  %v1011_v22 = vunpack.c.l.b16 %v854_v18  ;;  %v839_v23 = vld [vmem:[#allocation2 + $0x18] sm:$0xff]  ;;  %v850_v24 = vpack.c.bf16 %v840_v21, %v840_v21  ;;  %v2420_v12 = vadd.s32 56, %v2368_v28  ;;  %v662_v15 = vand.u32 7, %v630_v2 }
  0x99   : > { %609 = vst.msk [vmem:[#allocation2 + $0x28] sm:$0xff] %vm3314_vm1, %v600_v16  ;;  %v2366_v25 = vunpack.c.l.b16 %v853_v20  ;;  %v849_v26 = vpack.c.bf16 %v839_v23, %v839_v23  ;;  %v858_v50 = vld [vmem:[#allocation2 + $0x11] sm:$0xff]  ;;  %v859_v0 = vld [vmem:[#allocation2 + $0x19] sm:$0xff]  ;;  %vm2424_vm9 = vcmp.ne.s32.totalorder %v655_v3, 7  ;;  %v683_v23 = vand.u32 7, %v2414_v10 }
  0x9a   : > { %v1007_v27 = vunpack.c.l.b16 %v850_v24  ;;  %v868_v53 = vpack.c.bf16 %v858_v50, %v858_v50  ;;  %v779_v6 = vld [vmem:[#allocation2 + $0x17] sm:$0xff]  ;;  %v2408_v7 = vpack.c.bf16 %v859_v0, %v859_v0  ;;  %v780_v9 = vld [vmem:[#allocation2 + $0x1f] sm:$0xff]  ;;  %v2443_v24 = vadd.s32 40, %v2368_v28  ;;  %vm2466_vm13 = vmpackc.low %vm2424_vm9, %vm2424_vm9 }
  0x9b   : > { %v2371_v29 = vpack.c.b16 %v1011_v22, %v2366_v25  ;;  %v1006_v30 = vunpack.c.l.b16 %v849_v26  ;;  %v2422_v13 = vpack.c.bf16 %v779_v6, %v779_v6  ;;  %v2436_v21 = vpack.c.bf16 %v780_v9, %v780_v9  ;;  %v863_v49 = vld [vmem:[#allocation2 + $0x39] sm:$0xff] }
  0x9c   : > { %v908_v61 = vsel %vm2389_vm5, %v868_v53, 0  ;;  %v933_v18 = vsel %vm2384_vm4, %v868_v53, 0  ;;  %v669_v26 = vand.u32 7, %v2417_v11  ;;  %vm770_vm11 = vcmp.ne.s32.totalorder %v662_v15, 7  ;;  %v784_v51 = vld [vmem:[#allocation2 + $0x3f] sm:$0xff] }
  0x9d   : > { %1025 = vrot.lane.b32.xlu2 %v2371_v29, %s2257_s8  ;;  %v1101_v31 = vpack.c.b16 %v1006_v30, %v1005_v58  ;;  %v1015_v32 = vpack.c.b16 %v1007_v27, %v1006_v30  ;;  %v846_v34 = vld [vmem:[#allocation2 + $0x50] sm:$0xff]  ;;  %v1040_v5 = vunpack.c.l.b16 %v908_v61  ;;  %vm2454_vm12 = vcmp.ne.s32.totalorder %v655_v3, 0  ;;  %vm2479_vm14 = vmpackc.low %vm770_vm11, %vm770_vm11 }
  0x9e   : > { %v845_v33 = vld [vmem:[#allocation2 + $0x48] sm:$0xff]  ;;  %v856_v40 = vpack.c.bf16 %v846_v34, %v846_v34  ;;  %v2459_v35 = vadd.s32 64, %v2368_v28  ;;  %vm2483_vm15 = vcmp.ne.s32.totalorder %v662_v15, 0  ;;  %vm2487_vm2 = vcmp.ne.s32.totalorder %v683_v23, 0  ;;  %vm2520_vm8 = vmpackc.low %vm2454_vm12, %vm2454_vm12 }
  0x9f   : > { %1106 = vrot.lane.b32.xlu1 %v1101_v31, %s2258_s9  ;;  %1021 = vrot.lane.b32.xlu0 %v1015_v32, %s2257_s8  ;;  %v855_v36 = vpack.c.bf16 %v845_v33, %v845_v33  ;;  %v842_v42 = vld [vmem:[#allocation2 + $0x30] sm:$0xff]  ;;  %v1049_v17 = vpack.c.b16 %v1040_v5, %v1039_v4  ;;  %v690_v31 = vand.u32 7, %v2420_v12  ;;  %v920_v33 = vsel %vm2430_vm10, %v2422_v13, 0  ;;  %vm2531_vm9 = vmpackc.low %vm2483_vm15, %vm2483_vm15 }
  0xa0   : > { %v841_v37 = vld [vmem:[#allocation2 + $0x28] sm:$0xff]  ;;  %v2380_v47 = vunpack.c.l.b16 %v856_v40  ;;  %v852_v48 = vpack.c.bf16 %v842_v42, %v842_v42  ;;  %v3354_v40 = vmov 0  ;;  %v676_v43 = vand.u32 7, %v2443_v24  ;;  %vm2545_vm11 = vmpackc.low %vm2487_vm2, %vm2487_vm2 }
  0xa1   : > { %v1012_v38 = vunpack.c.l.b16 %v855_v36  ;;  %v851_v39 = vpack.c.bf16 %v841_v37, %v841_v37  ;;  %v778_v58 = vld [vmem:[#allocation2 + $0xf] sm:$0xff]  ;;  %v860_v14 = vld [vmem:[#allocation2 + $0x21] sm:$0xff]  ;;  %v3352_v36 = vmov 0  ;;  %v945_v37 = vsel %vm2401_vm7, %v2422_v13, 0 }
  0xa2   : > { %v1009_v56 = vunpack.c.l.b16 %v852_v48  ;;  %v2398_v62 = vpack.c.bf16 %v778_v58, %v778_v58  ;;  %v2448_v30 = vpack.c.bf16 %v860_v14, %v860_v14  ;;  %v3353_v36 = vsel %vm2466_vm13, 4294967295, %v3352_v36  ;;  %v781_v5 = vld [vmem:[#allocation2 + $0x27] sm:$0xff] }
  0xa3   : > { %v1104_v44 = vpack.c.b16 %v1012_v38, %v1011_v22  ;;  %v1008_v45 = vunpack.c.l.b16 %v851_v39  ;;  %v1018_v55 = vpack.c.b16 %v2380_v47, %v1012_v38  ;;  %v934_v22 = vsel %vm2389_vm5, %v2408_v7, 0 }
  0xa4   : > { %v919_v8 = vsel %vm2401_vm7, %v2398_v62, 0  ;;  %v946_v38 = vsel %vm2430_vm10, %v2436_v21, 0  ;;  %v2477_v39 = vadd.s32 72, %v2368_v28  ;;  %v3355_v40 = vsel %vm2479_vm14, 4294967295, %v3354_v40  ;;  %v783_v28 = vld [vmem:[#allocation2 + $0x37] sm:$0xff] }
  0xa5   : > { %1112 = vrot.lane.b32.xlu2 %v1104_v44, %s2258_s9  ;;  %v1102_v46 = vpack.c.b16 %v1008_v45, %v1007_v27  ;;  %v1016_v63 = vpack.c.b16 %v1009_v56, %v1008_v45  ;;  %v2434_v20 = vunpack.c.l.b16 %v919_v8  ;;  %v1103_v27 = vpack.c.b16 %v2366_v25, %v1009_v56 }
  0xa6   : > { %v1127_v25 = vunpack.c.l.b16 %v934_v22  ;;  %vm2494_vm3 = vcmp.ne.s32.totalorder %v669_v26, 0  ;;  %v1075_v45 = vunpack.c.l.b16 %v920_v33  ;;  %v960_v48 = vsel %vm2389_vm5, %v2448_v30, 0  ;;  %v786_v33 = vld [vmem:[#allocation2 + $0x4f] sm:$0xff] }
  0xa7   : > { %1108 = vrot.lane.b32.xlu0 %v1102_v46, %s2258_s9  ;;  %1189 = vrot.lane.b32.xlu1 %v1015_v32, %s2259_s10  ;;  %v1126_v32 = vunpack.c.l.b16 %v933_v18  ;;  %v959_v46 = vsel %vm2384_vm4, %v2408_v7, 0  ;;  %vm2506_vm6 = vcmp.ne.s32.totalorder %v690_v31, 0  ;;  %v909_v53 = vsel %vm2466_vm13, %v2408_v7, 0  ;;  %vm2575_vm0 = vmpackc.low %vm2494_vm3, %vm2494_vm3 }
  0xa8   : > { %v2515_v56 = vunpack.c.l.b16 %v946_v38  ;;  %v697_v59 = vand.u32 7, %v2459_v35  ;;  %v910_v61 = vsel %vm2479_vm14, %v2448_v30, 0  ;;  %v3366_v0 = vmov 0  ;;  %vm2564_vm2 = vmpackc.low %vm2506_vm6, %vm2506_vm6  ;;  %v864_v38 = vld [vmem:[#allocation2 + $0x41] sm:$0xff] }
  0xa9   : > { %v1136_v60 = vpack.c.b16 %v1127_v25, %v1126_v32  ;;  %v3367_v0 = vsel %vm2531_vm9, 4294967295, %v3366_v0  ;;  %v2535_v2 = vpack.c.bf16 %v783_v28, %v783_v28  ;;  %v704_v3 = vand.u32 7, %v2477_v39 }
  0xaa   : > { %v1210_v4 = vunpack.c.l.b16 %v960_v48  ;;  %v2538_v6 = vpack.c.bf16 %v863_v49, %v863_v49  ;;  %v2540_v7 = vpack.c.bf16 %v784_v51, %v784_v51  ;;  %v3368_v8 = vmov 0 }
  0xab   : > { %v3369_v8 = vsel %vm2545_vm11, 4294967295, %v3368_v8  ;;  %vm2551_vm12 = vcmp.ne.s32.totalorder %v676_v43, 0  ;;  %v1084_v10 = vpack.c.b16 %v1075_v45, %v2434_v20  ;;  %v1209_v14 = vunpack.c.l.b16 %v959_v46  ;;  %v785_v20 = vld [vmem:[#allocation2 + $0x47] sm:$0xff] }
  0xac   : > { %v1041_v15 = vunpack.c.l.b16 %v909_v53  ;;  %vm2557_vm15 = vcmp.ne.s32.totalorder %v683_v23, 7  ;;  %v3374_v18 = vmov 0  ;;  %v1042_v22 = vunpack.c.l.b16 %v910_v61  ;;  %vm2596_vm3 = vmpackc.low %vm2551_vm12, %vm2551_vm12 }
  0xad   : > { %1195 = vrot.lane.b32.xlu2 %v1018_v55, %s2259_s10  ;;  %v3375_v18 = vsel %vm2564_vm2, 4294967295, %v3374_v18  ;;  %v3376_v23 = vmov 0  ;;  %vm2581_vm6 = vcmp.ne.s32.totalorder %v697_v59, 0  ;;  %v935_v25 = vsel %vm2466_vm13, %v2448_v30, 0  ;;  %vm2614_vm12 = vmpackc.low %vm2557_vm15, %vm2557_vm15 }
  0xae   : > { %v3377_v23 = vsel %vm2575_vm0, 4294967295, %v3376_v23  ;;  %v3380_v41 = vmov 0  ;;  %vm766_vm1 = vcmp.ne.s32.totalorder %v704_v3, 0  ;;  %v1219_v42 = vpack.c.b16 %v1210_v4, %v1209_v14  ;;  %vm2630_vm5 = vmpackc.low %vm2581_vm6, %vm2581_vm6 }
  0xaf   : > { %1191 = vrot.lane.b32.xlu0 %v1016_v63, %s2259_s10  ;;  %1023 = vrot.lane.b32.xlu1 %v1016_v63, %s2257_s8  ;;  %v861_v63 = vld [vmem:[#allocation2 + $0x29] sm:$0xff]  ;;  %v3381_v41 = vsel %vm2596_vm3, 4294967295, %v3380_v41  ;;  %vm2607_vm4 = vcmp.ne.s32.totalorder %v690_v31, 7  ;;  %v834_v45 = vsel %vm2564_vm2, %v2540_v7, 0  ;;  %v2623_v46 = vpack.c.bf16 %v785_v20, %v785_v20  ;;  %vm2643_vm15 = vmpackc.low %vm766_vm1, %vm766_vm1 }
  0xb0   : > { %v2570_v32 = vpack.c.bf16 %v861_v63, %v861_v63  ;;  %v2625_v12 = vpack.c.bf16 %v786_v33, %v786_v33  ;;  %v2636_v49 = vunpack.c.l.b16 %v834_v45  ;;  %v2641_v51 = vpack.c.bf16 %v864_v38, %v864_v38  ;;  %vm2662_vm1 = vmpackc.low %vm2607_vm4, %vm2607_vm4 }
  0xb1   : > { %v921_v61 = vsel %vm2520_vm8, %v2436_v21, 0  ;;  %v835_v16 = vsel %vm2630_vm5, %v2623_v46, 0  ;;  %v1128_v45 = vunpack.c.l.b16 %v935_v25  ;;  %vm771_vm4 = vcmp.ne.s32.totalorder %v669_v26, 7  ;;  %v866_v26 = vld [vmem:[#allocation2 + $0x51] sm:$0xff] }
  0xb2   : > { %v936_v50 = vsel %vm2479_vm14, %v2570_v32, 0  ;;  %v2697_v34 = vunpack.c.l.b16 %v835_v16  ;;  %vm772_vm6 = vcmp.ne.s32.totalorder %v676_v43, 7 }
  0xb5   : > { %1054 = vrot.lane.b32.xlu2 %v1049_v17, %s2260_s11  ;;  %v782_v17 = vld [vmem:[#allocation2 + $0x2f] sm:$0xff] }
  0xb6   : > { %v2618_v28 = vpack.c.bf16 %v782_v17, %v782_v17  ;;  %v836_v17 = vsel %vm2643_vm15, %v2625_v12, 0 }
  0xb7   : > { %1027 = vrot.lane.b32.xlu0 %v1018_v55, %s2257_s8  ;;  %1110 = vrot.lane.b32.xlu1 %v1103_v27, %s2258_s9  ;;  %v2513_v55 = vunpack.c.l.b16 %v945_v37  ;;  %v2591_v37 = vpack.c.bf16 %v781_v5, %v781_v5  ;;  %v913_v5 = vsel %vm2614_vm12, %v2538_v6, 0  ;;  %v2701_v30 = vunpack.c.l.b16 %v836_v17 }
  0xb8   : > { %v832_v14 = vsel %vm2596_vm3, %v2618_v28, 0  ;;  %v948_v25 = vsel %vm2531_vm9, %v2618_v28, 0  ;;  %v939_v17 = vsel %vm2614_vm12, %v2641_v51, 0 }
  0xb9   : > { %v1171_v27 = vpack.c.b16 %v2515_v56, %v2513_v55  ;;  %v829_v55 = vsel %vm2520_vm8, %v2422_v13, 0  ;;  %v830_v56 = vsel %vm2531_vm9, %v2436_v21, 0  ;;  %v922_v63 = vsel %vm2531_vm9, %v2591_v37, 0  ;;  %vm2733_vm9 = vmpackc.low %vm771_vm4, %vm771_vm4 }
  0xba   : > { %v2671_v9 = vunpack.c.l.b16 %v829_v55  ;;  %v2673_v21 = vunpack.c.l.b16 %v830_v56  ;;  %v2695_v33 = vunpack.c.l.b16 %v832_v14  ;;  %v1077_v38 = vunpack.c.l.b16 %v922_v63 }
  0xbb   : > { %v1129_v55 = vunpack.c.l.b16 %v936_v50  ;;  %v1045_v14 = vunpack.c.l.b16 %v913_v5  ;;  %v993_v16 = vpack.c.b16 %v2701_v30, %v2697_v34  ;;  %v947_v63 = vsel %vm2520_vm8, %v2591_v37, 0 }
  0xbc   : > { %v961_v5 = vsel %vm2466_vm13, %v2570_v32, 0  ;;  %v1163_v11 = vunpack.c.l.b16 %v947_v63  ;;  %v1164_v24 = vunpack.c.l.b16 %v948_v25  ;;  %vm2737_vm13 = vmpackc.low %vm772_vm6, %vm772_vm6  ;;  %vm775_vm4 = vcmp.ne.s32.totalorder %v697_v59, 7 }
  0xbd   : > { %1141 = vrot.lane.b32.xlu2 %v1136_v60, %s2261_s12  ;;  %v1050_v60 = vpack.c.b16 %v1042_v22, %v1041_v15  ;;  %v914_v22 = vsel %vm2662_vm1, %v2641_v51, 0  ;;  %v1137_v50 = vpack.c.b16 %v1129_v55, %v1128_v45  ;;  %v2741_v55 = vpack.c.bf16 %v866_v26, %v866_v26 }
  0xbe   : > { %v1046_v52 = vunpack.c.l.b16 %v914_v22  ;;  %v1211_v22 = vunpack.c.l.b16 %v961_v5  ;;  %vm776_vm6 = vcmp.ne.s32.totalorder %v704_v3, 7  ;;  %v963_v35 = vsel %vm2733_vm9, %v2538_v6, 0 }
  0xbf   : > { %1193 = vrot.lane.b32.xlu1 %v2371_v29, %s2259_s10  ;;  %1089 = vrot.lane.b32.xlu0 %v1084_v10, %s2262_s13  ;;  %v833_v29 = vsel %vm2545_vm11, %v2535_v2, 0  ;;  %v831_v10 = vsel %vm2575_vm0, %v2591_v37, 0  ;;  %v964_v39 = vsel %vm2737_vm13, %v2641_v51, 0  ;;  %v950_v51 = vsel %vm2596_vm3, %v2540_v7, 0 }
  0xc0   : > { %v2634_v48 = vunpack.c.l.b16 %v833_v29  ;;  %v2682_v15 = vunpack.c.l.b16 %v831_v10  ;;  %v862_v29 = vld [vmem:[#allocation2 + $0x31] sm:$0xff]  ;;  %v1076_v10 = vunpack.c.l.b16 %v921_v61  ;;  %v1052_v61 = vpack.c.b16 %v1046_v52, %v1045_v14 }
  0xc1   : > { %v911_v14 = vsel %vm2733_vm9, %v2570_v32, 0  ;;  %v966_v32 = vsel %vm2662_vm1, %v2741_v55, 0 }
  0xc2   : > { %v992_v13 = vpack.c.b16 %v2636_v49, %v2634_v48  ;;  %v991_v56 = vpack.c.b16 %v2695_v33, %v2682_v15  ;;  %v1216_v26 = vunpack.c.l.b16 %v966_v32  ;;  %v1329_v48 = vld [vmem:[%s3308_s3 + $0x10] sm:$0x3] }
  0xc3   : > { %v1343_v49 = vunpack.c.l.b16 %v1329_v48 }
  0xc5   : > { %1224 = vrot.lane.b32.xlu2 %v1219_v42, %s2263_s14  ;;  %v865_v42 = vld [vmem:[#allocation2 + $0x49] sm:$0xff] }
  0xc6   : > { %v2707_v20 = vpack.c.bf16 %v865_v42, %v865_v42 }
  0xc7   : > { %1056 = vrot.lane.b32.xlu1 %v1050_v60, %s2260_s11  ;;  %1176 = vrot.lane.b32.xlu0 %v1171_v27, %s2264_s15  ;;  %v872_v60 = vpack.c.bf16 %v862_v29, %v862_v29  ;;  %v1085_v27 = vpack.c.b16 %v1077_v38, %v1076_v10  ;;  %v1132_v29 = vunpack.c.l.b16 %v939_v17  ;;  %v1172_v10 = vpack.c.b16 %v1164_v24, %v1163_v11 }
  0xc8   : > { %v940_v52 = vsel %vm2662_vm1, %v2707_v20, 0  ;;  %v965_v5 = vsel %vm2614_vm12, %v2707_v20, 0 }
  0xc9   : > { %v962_v37 = vsel %vm2479_vm14, %v872_v60, 0  ;;  %v1133_v42 = vunpack.c.l.b16 %v940_v52  ;;  %v1215_v24 = vunpack.c.l.b16 %v965_v5  ;;  %vm2787_vm14 = vmpackc.low %vm775_vm4, %vm775_vm4 }
  0xca   : > { %v1212_v38 = vunpack.c.l.b16 %v962_v37  ;;  %v1043_v37 = vunpack.c.l.b16 %v911_v14  ;;  %v951_v14 = vsel %vm2545_vm11, %v2623_v46, 0 }
  0xcb   : > { %v1139_v25 = vpack.c.b16 %v1133_v42, %v1132_v29  ;;  %v938_v29 = vsel %vm2737_vm13, %v2538_v6, 0  ;;  %v949_v6 = vsel %vm2575_vm0, %v2535_v2, 0 }
  0xcc   : > { %v1220_v63 = vpack.c.b16 %v1212_v38, %v1211_v22  ;;  %v937_v38 = vsel %vm2733_vm9, %v872_v60, 0 }
  0xcd   : > { %1091 = vrot.lane.b32.xlu2 %v1085_v27, %s2262_s13  ;;  %v912_v27 = vsel %vm2737_vm13, %v872_v60, 0  ;;  %v923_v60 = vsel %vm2575_vm0, %v2618_v28, 0  ;;  %vm1303_vm0 = vcmask 228352  }
  0xce   : > { %v1044_v17 = vunpack.c.l.b16 %v912_v27  ;;  %v952_v27 = vsel %vm2564_vm2, %v2625_v12, 0  ;;  %v1078_v5 = vunpack.c.l.b16 %v923_v60  ;;  %v929_v60 = vld [vmem:[#allocation2 + $0x58] sm:$0xff] }
  0xcf   : > { %1143 = vrot.lane.b32.xlu1 %v1137_v50, %s2261_s12  ;;  %1060 = vrot.lane.b32.xlu0 %v1052_v61, %s2260_s11  ;;  %v925_v50 = vsel %vm2545_vm11, %v2540_v7, 0  ;;  %v926_v61 = vsel %vm2564_vm2, %v2623_v46, 0  ;;  %v1167_v46 = vunpack.c.l.b16 %v951_v14  ;;  %vm2791_vm11 = vmpackc.low %vm776_vm6, %vm776_vm6  ;;  %v1166_v14 = vunpack.c.l.b16 %v950_v51 }
  0xd0   : > { %v1080_v52 = vunpack.c.l.b16 %v925_v50  ;;  %v1081_v11 = vunpack.c.l.b16 %v926_v61  ;;  %v1051_v22 = vpack.c.b16 %v1044_v17, %v1043_v37  ;;  %v1131_v50 = vunpack.c.l.b16 %v938_v29 }
  0xd1   : > { %v1168_v61 = vunpack.c.l.b16 %v952_v27  ;;  %vm3403_vm6 = vcmask 64512   ;;  %vm3415_vm2 = vcmask 130048  }
  0xd2   : > { %v1087_v42 = vpack.c.b16 %v1081_v11, %v1080_v52  ;;  %v917_v52 = vld [vmem:[#allocation2 + $0x57] sm:$0xff]  ;;  %v915_v11 = vsel %vm2787_vm14, %v2707_v20, 0 }
  0xd3   : > { %v1174_v59 = vpack.c.b16 %v1168_v61, %v1167_v46  ;;  %v918_v20 = vpack.c.bf16 %v917_v52, %v917_v52  ;;  %v1047_v29 = vunpack.c.l.b16 %v915_v11  ;;  %v2822_v46 = vpop.permute.xlu2 %1019  ;;  %v930_v61 = vpack.c.bf16 %v929_v60, %v929_v60 }
  0xd5   : > { %1178 = vrot.lane.b32.xlu2 %v1172_v10, %s2264_s15  ;;  %v1222_v10 = vpack.c.b16 %v1216_v26, %v1215_v24  ;;  %v916_v24 = vsel %vm2791_vm11, %v2741_v55, 0  ;;  %v1213_v26 = vunpack.c.l.b16 %v963_v35  ;;  %v928_v7 = vsel %vm2643_vm15, %v918_v20, 0 }
  0xd7   : > { %1226 = vrot.lane.b32.xlu1 %v1220_v63, %s2263_s14  ;;  %1147 = vrot.lane.b32.xlu0 %v1139_v25, %s2261_s12  ;;  %v924_v63 = vsel %vm2596_vm3, %v2535_v2, 0  ;;  %v1130_v25 = vunpack.c.l.b16 %v937_v38  ;;  %v931_v38 = vld [vmem:[#allocation2 + $0x59] sm:$0xff]  ;;  %v927_v2 = vsel %vm2630_vm5, %v2625_v12, 0  ;;  %vm3334_vm3 = vcmask 195584  }
  0xd8   : > { %v1079_v28 = vunpack.c.l.b16 %v924_v63  ;;  %v932_v27 = vpack.c.bf16 %v931_v38, %v931_v38  ;;  %v1082_v12 = vunpack.c.l.b16 %v927_v2 }
  0xd9   : > { %v1138_v37 = vpack.c.b16 %v1131_v50, %v1130_v25 }
  0xda   : > { %v1086_v3 = vpack.c.b16 %v1079_v28, %v1078_v5  ;;  %v943_v5 = vld [vmem:[#allocation2 + $0x5f] sm:$0xff]  ;;  %v942_v35 = vsel %vm2791_vm11, %v932_v27, 0  ;;  %v967_v38 = vsel %vm2787_vm14, %v932_v27, 0 }
  0xdb   : > { %v957_v28 = vld [vmem:[#allocation2 + $0x61] sm:$0xff]  ;;  %v1217_v60 = vunpack.c.l.b16 %v967_v38 }
  0xdc   : > { %v958_v52 = vpack.c.bf16 %v957_v28, %v957_v28 }
  0xdd   : > { %1058 = vrot.lane.b32.xlu2 %v1051_v22, %s2260_s11  ;;  %v1214_v22 = vunpack.c.l.b16 %v964_v39  ;;  %v1083_v39 = vunpack.c.l.b16 %v928_v7 }
  0xdf   : > { %1095 = vrot.lane.b32.xlu1 %v1087_v42, %s2262_s13  ;;  %1230 = vrot.lane.b32.xlu0 %v1222_v10, %s2263_s14  ;;  %v1048_v42 = vunpack.c.l.b16 %v916_v24  ;;  %v1165_v10 = vunpack.c.l.b16 %v949_v6  ;;  %v1221_v63 = vpack.c.b16 %v1214_v22, %v1213_v26  ;;  %v1135_v24 = vunpack.c.l.b16 %v942_v35  ;;  %v2100_v35 = vld [vmem:[%s3308_s3 + $0x8] sm:$0xff] }
  0xe0   : > { %v1100_v6 = vunpack.c.l.b16 %v930_v61  ;;  %v1088_v51 = vpack.c.b16 %v1083_v39, %v1082_v12  ;;  %v953_v26 = vsel %vm2630_vm5, %v918_v20, 0  ;;  %vm3400_vm5 = vcmask 31744   ;;  %v2099_v12 = vld [vmem:[%s3308_s3] sm:$0xff] }
  0xe1   : > { %v1053_v25 = vpack.c.b16 %v1048_v42, %v1047_v29  ;;  %v1173_v50 = vpack.c.b16 %v1166_v14, %v1165_v10  ;;  %v968_v29 = vsel %vm2791_vm11, %v958_v52, 0  ;;  %v1169_v14 = vunpack.c.l.b16 %v953_v26  ;;  %v777_v39 = vld [vmem:[#allocation2 + $0x7] sm:$0xff]  ;;  %vm3401_vm11 = vmmov %vm3400_vm5 }
  0xe2   : > { %v1105_v10 = vpack.c.b16 %v1100_v6, %v2380_v47  ;;  %v1346_v61 = vpack.c.b16 %v1343_v49, %v1343_v49  ;;  %vm3402_vm4 = vmmov %vm3400_vm5 }
  0xe5   : > { %1145 = vrot.lane.b32.xlu2 %v1138_v37, %s2261_s12  ;;  %v941_v37 = vsel %vm2787_vm14, %v2741_v55, 0  ;;  %vm1360_vm14 = vcmask 1041408  }
  0xe6   : > { %v1134_v11 = vunpack.c.l.b16 %v941_v37 }
  0xe7   : > { %1182 = vrot.lane.b32.xlu1 %v1174_v59, %s2264_s15  ;;  %1093 = vrot.lane.b32.xlu0 %v1086_v3, %s2262_s13  ;;  %v944_v59 = vpack.c.bf16 %v943_v5, %v943_v5  ;;  %v955_v3 = vld [vmem:[#allocation2 + $0x60] sm:$0xff]  ;;  %v1362_v5 = vsel %vm1360_vm14, %v1346_v61, 0  ;;  %vm1281_vm14 = vcmask 162816  }
  0xe8   : > { %v956_v55 = vpack.c.bf16 %v955_v3, %v955_v3  ;;  %v1140_v42 = vpack.c.b16 %v1135_v24, %v1134_v11  ;;  %1369 = vmatpush.bf16.msra.mxu0 %v1362_v5  ;;  %2163 = vmatpush.bf16.msra.mxu2 %v1362_v5  ;;  %v787_v11 = vpack.c.bf16 %v777_v39, %v777_v39 }
  0xe9   : > { %v954_v22 = vsel %vm2643_vm15, %v944_v59, 0  ;;  %vm3339_vm15 = vcmask 97280  }
  0xea   : > { %v1170_v20 = vunpack.c.l.b16 %v954_v22  ;;  %v1187_v53 = vunpack.c.l.b16 %v956_v55  ;;  %v827_v24 = vsel %vm2401_vm7, %v787_v11, 0 }
  0xec   : > { %v1175_v17 = vpack.c.b16 %v1170_v20, %v1169_v14  ;;  %v1188_v27 = vpack.c.b16 %v1187_v53, %v1100_v6  ;;  %1370 = vmatpush.bf16.msra.mxu0 %v2100_v35  ;;  %2164 = vmatpush.bf16.msra.mxu2 %v2100_v35  ;;  %v828_v6 = vsel %vm2430_vm10, %v2398_v62, 0 }
  0xed   : > { %1228 = vrot.lane.b32.xlu2 %v1221_v63, %s2263_s14  ;;  %v1218_v63 = vunpack.c.l.b16 %v968_v29  ;;  %v980_v26 = vunpack.c.l.b16 %v828_v6 }
  0xef   : > { %1062 = vrot.lane.b32.xlu1 %v1053_v25, %s2260_s11  ;;  %1180 = vrot.lane.b32.xlu0 %v1173_v50, %s2264_s15  ;;  %v1223_v2 = vpack.c.b16 %v1218_v63, %v1217_v60 }
  0xf0   : > { %1371 = vmatpush.bf16.msra.mxu0 %v2099_v12  ;;  %2165 = vmatpush.bf16.msra.mxu2 %v2099_v12 }
  0xf5   : > { %1097 = vrot.lane.b32.xlu2 %v1088_v51, %s2262_s13  ;;  %v979_v51 = vunpack.c.l.b16 %v827_v24 }
  0xf7   : > { %1149 = vrot.lane.b32.xlu1 %v1140_v42, %s2261_s12  ;;  %1114 = vrot.lane.b32.xlu0 %v1105_v10, %s2258_s9  ;;  %v1026_v31 = vpop.permute.xlu2 %1025  ;;  %v989_v42 = vpack.c.b16 %v980_v26, %v979_v51 }
  0xf8   : > { %v2847_v32 = vsel %vm3400_vm5, %v992_v13, %v1026_v31  ;;  %vm3333_vm5 = vcmask 130048  }
  0xf9   : > { %v1236_v10 = vsel %vm3402_vm4, %v989_v42, %v2822_v46  ;;  %vm3336_vm4 = vcmask 293888  }
  0xfd   : > { %1184 = vrot.lane.b32.xlu2 %v1175_v17, %s2264_s15 }
  0xff   : > { %1197 = vrot.lane.b32.xlu0 %v1188_v27, %s2259_s10  ;;  %1232 = vrot.lane.b32.xlu1 %v1223_v2, %s2263_s14  ;;  %v2852_v47 = vpop.permute.xlu2 %1112  ;;  %v3404_v27 = vpack.c.b16 %v2673_v21, %v2671_v9 }
 0x107   : > { %v2854_v7 = vpop.permute.xlu2 %1195 }
 0x10f   : > { %v1055_v13 = vpop.permute.xlu2 %1054 }
 0x110   : > { %v1250_v62 = vsel %vm3403_vm6, %v1236_v10, %v1055_v13  ;;  %vm3405_vm6 = vcmask 31744  }
 0x111   : > { %v1107_v25 = vpop.permute.xlu1 %1106  ;;  %v1022_v50 = vpop.permute.xlu0 %1021 }
 0x112   : > { %v1239_v2 = vsel %vm3405_vm6, %v3404_v27, %v1022_v50  ;;  %vm3409_vm6 = vcmask 261120  }
 0x117   : > { %v1142_v59 = vpop.permute.xlu2 %1141 }
 0x119   : > { %v1109_v28 = vpop.permute.xlu0 %1108  ;;  %v1190_v37 = vpop.permute.xlu1 %1189 }
 0x11f   : > { %v1225_v38 = vpop.permute.xlu2 %1224 }
 0x121   : > { %v1192_v3 = vpop.permute.xlu0 %1191  ;;  %v1024_v52 = vpop.permute.xlu1 %1023 }
 0x127   : > { %v1092_v53 = vpop.permute.xlu2 %1091 }
 0x129   : > { %v1028_v55 = vpop.permute.xlu0 %1027  ;;  %v1111_v22 = vpop.permute.xlu1 %1110 }
 0x12a   : > { %v2874_v29 = vsel %vm3401_vm11, %v993_v16, %v1028_v55  ;;  %vm3335_vm11 = vcmask 261120  }
 0x131   : > { %v1194_v14 = vpop.permute.xlu1 %1193  ;;  %v1090_v31 = vpop.permute.xlu0 %1089 }
 0x132   : > { %v1261_v20 = vsel %vm3339_vm15, %v1250_v62, %v1090_v31 }
 0x133   : > { %v1272_v60 = vsel %vm3333_vm5, %v1261_v20, %v1107_v25  ;;  %v1179_v25 = vpop.permute.xlu2 %1178  ;;  %vm3406_vm5 = vcmask 64512  }
 0x134   : > { %v1283_v30 = vsel %vm1281_vm14, %v1272_v60, %v1142_v59 }
 0x139   : > { %v1057_v34 = vpop.permute.xlu1 %1056  ;;  %v1177_v16 = vpop.permute.xlu0 %1176 }
 0x13a   : > { %v1294_v46 = vsel %vm3334_vm3, %v1283_v30, %v1177_v16  ;;  %v1252_v48 = vsel %vm3406_vm5, %v1239_v2, %v1057_v34  ;;  %vm3407_vm3 = vcmask 130048  }
 0x13b   : > { %v1305_v63 = vsel %vm1303_vm0, %v1294_v46, %v1190_v37  ;;  %v1263_v49 = vsel %vm3339_vm15, %v1252_v48, %v1092_v53  ;;  %v1059_v35 = vpop.permute.xlu2 %1058 }
 0x13c   : > { %v1316_v17 = vsel %vm3335_vm11, %v1305_v63, %v1225_v38  ;;  %v1274_v5 = vsel %vm3407_vm3, %v1263_v49, %v1109_v28  ;;  %vm3408_vm11 = vcmask 195584  }
 0x13d   : > { %2067 = vmatmul.msk.bf16.vlgmr.msra.gmra.mxu0 %vm3336_vm4, %v1316_v17 }
 0x141   : > { %v1144_v13 = vpop.permute.xlu1 %1143  ;;  %v1061_v61 = vpop.permute.xlu0 %1060 }
 0x142   : > { %v1285_v37 = vsel %vm1281_vm14, %v1274_v5, %v1144_v13  ;;  %v1256_v6 = vsel %vm3406_vm5, %v2847_v32, %v1061_v61  ;;  %v3424_v5 = vmov 0.0  }
 0x143   : > { %v1296_v12 = vsel %vm3408_vm11, %v1285_v37, %v1179_v25  ;;  %v1146_v24 = vpop.permute.xlu2 %1145  ;;  %vm3410_vm11 = vcmask 31744  }
 0x144   : > { %v1307_v21 = vsel %vm1303_vm0, %v1296_v12, %v1192_v3  ;;  %v1242_v3 = vsel %vm3410_vm11, %v991_v56, %v1024_v52 }
 0x149   : > { %v1227_v39 = vpop.permute.xlu1 %1226  ;;  %v1148_v9 = vpop.permute.xlu0 %1147 }
 0x14a   : > { %v1318_v50 = vsel %vm3409_vm6, %v1307_v21, %v1227_v39  ;;  %vm3411_vm6 = vmmov %vm3406_vm5  ;;  %vm3413_vm5 = vcmask 261120  }
 0x14b   : > { %v1254_v42 = vsel %vm3411_vm6, %v1242_v3, %v1059_v35  ;;  %v1229_v62 = vpop.permute.xlu2 %1228 }
 0x14d   : > { %2068 = vmatmul.msk.bf16.gmra.mxu0 %vm3336_vm4, %v1318_v50  ;;  %vm3412_vm4 = vcmask 195584  }
 0x14e   : > { %vm3416_vm11 = vmmov %vm3412_vm4 }
 0x151   : > { %v1096_v59 = vpop.permute.xlu1 %1095  ;;  %v1231_v11 = vpop.permute.xlu0 %1230 }
 0x152   : > { %v1267_v28 = vsel %vm3339_vm15, %v1256_v6, %v1096_v59 }
 0x153   : > { %v1278_v51 = vsel %vm3407_vm3, %v1267_v28, %v2852_v47  ;;  %vm3414_vm3 = vcmask 293888  }
 0x154   : > { %v1289_v55 = vsel %vm1281_vm14, %v1278_v51, %v1148_v9  ;;  %vm3418_vm6 = vmmov %vm3414_vm3 }
 0x159   : > { %v1183_v26 = vpop.permute.xlu1 %1182  ;;  %v1094_v38 = vpop.permute.xlu0 %1093 }
 0x15a   : > { %v1300_v10 = vsel %vm3412_vm4, %v1289_v55, %v1183_v26  ;;  %v1265_v32 = vsel %vm3339_vm15, %v1254_v42, %v1094_v38  ;;  %vm3417_vm4 = vmmov %vm3413_vm5  ;;  %vm3419_vm15 = vcmask 64512  }
 0x15b   : > { %v1311_v31 = vsel %vm1303_vm0, %v1300_v10, %v2854_v7  ;;  %v1276_v15 = vsel %vm3415_vm2, %v1265_v32, %v1111_v22  ;;  %v1098_v7 = vpop.permute.xlu2 %1097 }
 0x15c   : > { %v1322_v47 = vsel %vm3413_vm5, %v1311_v31, %v1231_v11  ;;  %v1287_v56 = vsel %vm1281_vm14, %v1276_v15, %v1146_v24  ;;  %vm3420_vm5 = vcmask 97280  }
 0x15d   : > { %2070 = vmatmul.msk.bf16.vlgmr.msra.gmra.mxu2 %vm3414_vm3, %v1322_v47  ;;  %vm3421_vm3 = vmmov %vm3416_vm11 }
 0x161   : > { %v1063_v33 = vpop.permute.xlu1 %1062  ;;  %v1181_v52 = vpop.permute.xlu0 %1180 }
 0x162   : > { %v1298_v20 = vsel %vm3416_vm11, %v1287_v56, %v1181_v52  ;;  %v1258_v34 = vsel %vm3419_vm15, %v2874_v29, %v1063_v33  ;;  %vm3422_vm11 = vmmov %vm3417_vm4  ;;  %v2933_v29 = vld [vmem:[%s3309_s4] ss:$0 sm:$0xff] }
 0x163   : > { %v1309_v53 = vsel %vm1303_vm0, %v1298_v20, %v1194_v14  ;;  %v1269_v22 = vsel %vm3420_vm5, %v1258_v34, %v1098_v7  ;;  %v1185_v17 = vpop.permute.xlu2 %1184 }
 0x164   : > { %v1320_v60 = vsel %vm3417_vm4, %v1309_v53, %v1229_v62  ;;  %vm3423_vm4 = vmmov %vm3418_vm6 }
 0x165   : > { %2069 = vmatmul.msk.bf16.gmra.mxu0 %vm3418_vm6, %v1320_v60 }
 0x169   : > { %v1150_v30 = vpop.permute.xlu1 %1149  ;;  %v1115_v16 = vpop.permute.xlu0 %1114 }
 0x16a   : > { %v1280_v46 = vsel %vm3415_vm2, %v1269_v22, %v1115_v16  ;;  %vm3429_vm2 = vnez %v3343_v57 }
 0x16b   : > { %v1291_v63 = vsel %vm1281_vm14, %v1280_v46, %v1150_v30  ;;  %vm3425_vm14 = vmmov %vm3419_vm15 }
 0x16c   : > { %v1302_v27 = vsel %vm3421_vm3, %v1291_v63, %v1185_v17  ;;  %vm3430_vm3 = vnez %v3341_v54 }
 0x171   : > { %v1198_v14 = vpop.permute.xlu0 %1197  ;;  %v1233_v2 = vpop.permute.xlu1 %1232 }
 0x172   : > { %v1313_v25 = vsel %vm1303_vm0, %v1302_v27, %v1198_v14  ;;  %vm3426_vm0 = vmmov %vm3425_vm14 }
 0x173   : > { %v1324_v48 = vsel %vm3422_vm11, %v1313_v25, %v1233_v2  ;;  %vm3427_vm6 = vmmov %vm3426_vm0 }
 0x174   : > { %2071 = vmatmul.msk.bf16.gmra.mxu2 %vm3423_vm4, %v1324_v48  ;;  %vm3428_vm5 = vmmov %vm3426_vm0 }
 0x175   : > { %vm3431_vm11 = vmmov %vm3426_vm0 }
 0x176   : > { %vm3432_vm4 = vmmov %vm3426_vm0 }
 0x1ba   : > { %v1373_v49 = vpop.f32.mrf.mxu0 }
 0x1bb   : > { %v1374_v13 = vadd.f32 %v2933_v29, %v1373_v49 }
 0x1bd   : > { %v1398_v61 = vmax.f32 %v1374_v13, 0.0 }
 0x1bf   : > { %1408 = vst.msk [vmem:[#allocation3 + $0x8] sm:$0xff] %vm3419_vm15, %v1398_v61  ;;  %vm3433_vm15 = vmmov %vm3426_vm0 }
 0x1c0   : > { %1421 = vst.msk [vmem:[#allocation3 + $0x8] sm:$0xff] %vm3425_vm14, %v3424_v5  ;;  %vm3434_vm14 = vnez %v3367_v0 }
 0x1c2   : > { %v1375_v37 = vpop.f32.mrf.mxu0 }
 0x1c3   : > { %v1376_v35 = vadd.f32 %v2933_v29, %v1375_v37 }
 0x1c5   : > { %v1399_v12 = vmax.f32 %v1376_v35, 0.0 }
 0x1c7   : > { %1409 = vst.msk [vmem:[#allocation3 + $0x10] sm:$0xff] %vm3426_vm0, %v1399_v12  ;;  %v1447_v39 = vld [vmem:[#allocation3 + $0x8] sm:$0xff] }
 0x1c8   : > { %v1455_v50 = vpack.c.bf16 %v1447_v39, %v1447_v39 }
 0x1ca   : > { %v1378_v9 = vpop.f32.mrf.mxu0  ;;  %v1559_v6 = vunpack.c.l.b16 %v1455_v50 }
 0x1cb   : > { %v1379_v21 = vadd.f32 %v2933_v29, %v1378_v9 }
 0x1cd   : > { %v1400_v59 = vmax.f32 %v1379_v21, 0.0 }
 0x1ce   : > { %v1448_v11 = vld [vmem:[#allocation3 + $0x10] sm:$0xff] }
 0x1cf   : > { %1410 = vst.msk [vmem:[#allocation3 + $0x18] sm:$0xff] %vm3427_vm6, %v1400_v59  ;;  %v1456_v24 = vpack.c.bf16 %v1448_v11, %v1448_v11  ;;  %v1463_v32 = vld [vmem:[#allocation3 + $0x9] sm:$0xff]  ;;  %vm3435_vm6 = vmmov %vm3426_vm0 }
 0x1d0   : > { %v1471_v47 = vpack.c.bf16 %v1463_v32, %v1463_v32 }
 0x1d1   : > { %v1560_v28 = vunpack.c.l.b16 %v1456_v24 }
 0x1d2   : > { %v1380_v51 = vpop.f32.mrf.mxu0  ;;  %v1479_v56 = vsel %vm3430_vm3, %v1471_v47, 0 }
 0x1d3   : > { %v1381_v3 = vadd.f32 %v2933_v29, %v1380_v51  ;;  %v1567_v26 = vpack.c.b16 %v1560_v28, %v1559_v6  ;;  %v1587_v60 = vunpack.c.l.b16 %v1479_v56 }
 0x1d5   : > { %v1401_v55 = vmax.f32 %v1381_v3, 0.0  ;;  %1571 = vrot.lane.b32.xlu2 %v1567_v26, %s2260_s11 }
 0x1d6   : > { %v1449_v38 = vld [vmem:[#allocation3 + $0x18] sm:$0xff] }
 0x1d7   : > { %v1464_v42 = vld [vmem:[#allocation3 + $0x11] sm:$0xff]  ;;  %1411 = vst.msk [vmem:[#allocation3 + $0x20] sm:$0xff] %vm3428_vm5, %v1401_v55  ;;  %v1457_v10 = vpack.c.bf16 %v1449_v38, %v1449_v38  ;;  %vm3436_vm5 = vmmov %vm3426_vm0 }
 0x1d8   : > { %v2946_v31 = vpack.c.bf16 %v1464_v42, %v1464_v42  ;;  %v1425_v22 = vld [vmem:[#allocation3 + $0x17] sm:$0xff]  ;;  %v1424_v55 = vld [vmem:[#allocation3 + $0xf] sm:$0xff] }
 0x1d9   : > { %v2948_v62 = vunpack.c.l.b16 %v1457_v10  ;;  %v2962_v17 = vpack.c.bf16 %v1425_v22, %v1425_v22  ;;  %v2994_v32 = vpack.c.bf16 %v1424_v55, %v1424_v55 }
 0x1da   : > { %v1480_v33 = vsel %vm3429_vm2, %v2946_v31, 0 }
 0x1db   : > { %v1637_v15 = vpack.c.b16 %v2948_v62, %v1560_v28  ;;  %v1588_v52 = vunpack.c.l.b16 %v1480_v33  ;;  %v1441_v13 = vsel %vm2520_vm8, %v2962_v17, 0  ;;  %v1490_v33 = vsel %vm2430_vm10, %v2962_v17, 0 }
 0x1dc   : > { %v2977_v12 = vunpack.c.l.b16 %v1441_v13  ;;  %v1616_v22 = vunpack.c.l.b16 %v1490_v33 }
 0x1dd   : > { %1641 = vrot.lane.b32.xlu1 %v1637_v15, %s2263_s14  ;;  %v1595_v16 = vpack.c.b16 %v1588_v52, %v1587_v60 }
 0x1de   : > { %v1426_v63 = vld [vmem:[#allocation3 + $0x1f] sm:$0xff] }
 0x1df   : > { %v2965_v2 = vpack.c.bf16 %v1426_v63, %v1426_v63  ;;  %v1450_v63 = vld [vmem:[#allocation3 + $0x20] sm:$0xff] }
 0x1e0   : > { %v1388_v20 = vpop.f32.mrf.mxu2 }
 0x1e1   : > { %v1389_v53 = vadd.f32 %v2933_v29, %v1388_v20  ;;  %v1442_v37 = vsel %vm3434_vm14, %v2965_v2, 0 }
 0x1e2   : > { %v1383_v7 = vpop.f32.mrf.mxu0  ;;  %v2975_v35 = vunpack.c.l.b16 %v1442_v37 }
 0x1e3   : > { %v1404_v34 = vmax.f32 %v1389_v53, 0.0  ;;  %v1384_v30 = vadd.f32 %v2933_v29, %v1383_v7  ;;  %v1489_v53 = vsel %vm2401_vm7, %v2994_v32, 0 }
 0x1e4   : > { %v1548_v9 = vpack.c.b16 %v2975_v35, %v2977_v12  ;;  %v1615_v13 = vunpack.c.l.b16 %v1489_v53 }
 0x1e5   : > { %1414 = vst.msk [vmem:[#allocation3 + $0x38] sm:$0xff] %vm3431_vm11, %v1404_v34  ;;  %v1402_v46 = vmax.f32 %v1384_v30, 0.0  ;;  %1599 = vrot.lane.b32.xlu1 %v1595_v16, %s2258_s9  ;;  %vm3437_vm11 = vmmov %vm3426_vm0 }
 0x1e7   : > { %1412 = vst.msk [vmem:[#allocation3 + $0x28] sm:$0xff] %vm3432_vm4, %v1402_v46  ;;  %vm3438_vm4 = vnez %v3375_v18 }
 0x1e8   : > { %v1390_v27 = vpop.f32.mrf.mxu2 }
 0x1e9   : > { %v1391_v14 = vadd.f32 %v2933_v29, %v1390_v27 }
 0x1ea   : > { %v1385_v25 = vpop.f32.mrf.mxu0 }
 0x1eb   : > { %v1405_v48 = vmax.f32 %v1391_v14, 0.0  ;;  %v1386_v49 = vadd.f32 %v2933_v29, %v1385_v25 }
 0x1ec   : > { %v1453_v39 = vld [vmem:[#allocation3 + $0x38] sm:$0xff] }
 0x1ed   : > { %1415 = vst.msk [vmem:[#allocation3 + $0x40] sm:$0xff] %vm3433_vm15, %v1405_v48  ;;  %v1403_v61 = vmax.f32 %v1386_v49, 0.0  ;;  %v1461_v21 = vpack.c.bf16 %v1453_v39, %v1453_v39  ;;  %vm3439_vm15 = vnez %v3369_v8 }
 0x1ee   : > { %v1427_v34 = vld [vmem:[#allocation3 + $0x27] sm:$0xff] }
 0x1ef   : > { %1413 = vst.msk [vmem:[#allocation3 + $0x30] sm:$0xff] %vm3426_vm0, %v1403_v61  ;;  %v2982_v24 = vunpack.c.l.b16 %v1461_v21  ;;  %v3026_v39 = vpack.c.bf16 %v1427_v34, %v1427_v34  ;;  %vm3440_vm0 = vnez %v3377_v23 }
 0x1f4   : > { %v1454_v50 = vld [vmem:[#allocation3 + $0x40] sm:$0xff] }
 0x1f5   : > { %v1462_v59 = vpack.c.bf16 %v1454_v50, %v1454_v50  ;;  %v1469_v26 = vld [vmem:[#allocation3 + $0x39] sm:$0xff] }
 0x1f6   : > { %v2992_v10 = vpack.c.bf16 %v1469_v26, %v1469_v26  ;;  %v1430_v60 = vld [vmem:[#allocation3 + $0x3f] sm:$0xff]  ;;  %v1429_v7 = vld [vmem:[#allocation3 + $0x37] sm:$0xff]  ;;  %v1428_v49 = vld [vmem:[#allocation3 + $0x2f] sm:$0xff] }
 0x1f7   : > { %v1393_v11 = vpop.f32.mrf.mxu2  ;;  %v2984_v6 = vunpack.c.l.b16 %v1462_v59  ;;  %v3022_v61 = vpack.c.bf16 %v1430_v60, %v1430_v60  ;;  %v3024_v37 = vpack.c.bf16 %v1429_v7, %v1429_v7  ;;  %v1458_v59 = vpack.c.bf16 %v1450_v63, %v1450_v63 }
 0x1f8   : > { %v1394_v28 = vadd.f32 %v2933_v29, %v1393_v11  ;;  %v1485_v20 = vsel %vm2614_vm12, %v2992_v10, 0  ;;  %v3031_v26 = vpack.c.bf16 %v1428_v49, %v1428_v49  ;;  %v1506_v23 = vsel %vm2737_vm13, %v2992_v10, 0 }
 0x1f9   : > { %v1570_v51 = vpack.c.b16 %v2984_v6, %v2982_v24  ;;  %v1593_v25 = vunpack.c.l.b16 %v1485_v20  ;;  %v1495_v55 = vsel %vm3439_vm15, %v3022_v61, 0 }
 0x1fa   : > { %v1406_v3 = vmax.f32 %v1394_v28, 0.0  ;;  %v1623_v28 = vpack.c.b16 %v1616_v22, %v1615_v13  ;;  %v1466_v13 = vld [vmem:[#allocation3 + $0x21] sm:$0xff]  ;;  %v1514_v8 = vsel %vm3434_vm14, %v3031_v26, 0 }
 0x1fb   : > { %1712 = vrot.lane.b32.xlu0 %v1570_v51, %s2265_s26 }
 0x1fc   : > { %1416 = vst.msk [vmem:[#allocation3 + $0x48] sm:$0xff] %vm3435_vm6, %v1406_v3  ;;  %v1465_v3 = vld [vmem:[#allocation3 + $0x19] sm:$0xff]  ;;  %vm3441_vm6 = vnez %v3381_v41 }
 0x1fd   : > { %v3052_v20 = vpack.c.bf16 %v1465_v3, %v1465_v3  ;;  %v1444_v34 = vsel %vm3441_vm6, %v3031_v26, 0 }
 0x1fe   : > { %v3065_v22 = vunpack.c.l.b16 %v1444_v34 }
 0x1ff   : > { %v1395_v38 = vpop.f32.mrf.mxu2 }
 0x200   : > { %v1396_v42 = vadd.f32 %v2933_v29, %v1395_v38  ;;  %v1527_v29 = vsel %vm2733_vm9, %v2992_v10, 0 }
 0x201   : > { %v1728_v27 = vunpack.c.l.b16 %v1527_v29 }
 0x202   : > { %v1407_v47 = vmax.f32 %v1396_v42, 0.0  ;;  %v1446_v42 = vsel %vm3438_vm4, %v3022_v61, 0 }
 0x203   : > { %1577 = vrot.lane.b32.xlu0 %v1570_v51, %s2260_s11  ;;  %v1470_v15 = vld [vmem:[#allocation3 + $0x41] sm:$0xff]  ;;  %v3056_v60 = vunpack.c.l.b16 %v1446_v42 }
 0x204   : > { %v1487_v56 = vld [vmem:[#allocation3 + $0x47] sm:$0xff]  ;;  %1417 = vst.msk [vmem:[#allocation3 + $0x50] sm:$0xff] %vm3436_vm5, %v1407_v47  ;;  %v3001_v52 = vpack.c.bf16 %v1470_v15, %v1470_v15  ;;  %v1445_v47 = vsel %vm3439_vm15, %v3024_v37, 0  ;;  %v1443_v15 = vsel %vm3440_vm0, %v3026_v39, 0 }
 0x205   : > { %1422 = vst.msk [vmem:[#allocation3 + $0x50] sm:$0xff] %vm3437_vm11, %v3424_v5  ;;  %v3020_v46 = vpack.c.bf16 %v1487_v56, %v1487_v56  ;;  %v1497_v5 = vld [vmem:[#allocation3 + $0x48] sm:$0xff]  ;;  %v3048_v56 = vunpack.c.l.b16 %v1458_v59  ;;  %v3058_v7 = vunpack.c.l.b16 %v1445_v47  ;;  %v1468_v59 = vld [vmem:[#allocation3 + $0x31] sm:$0xff]  ;;  %vm1856_vm11 = vcmask 588800  }
 0x206   : > { %v1528_v30 = vsel %vm2737_vm13, %v3001_v52, 0  ;;  %v1486_v16 = vsel %vm2662_vm1, %v3001_v52, 0  ;;  %v1498_v11 = vpack.c.bf16 %v1497_v5, %v1497_v5 }
 0x207   : > { %v1729_v14 = vunpack.c.l.b16 %v1528_v30  ;;  %v1594_v48 = vunpack.c.l.b16 %v1486_v16  ;;  %v1496_v51 = vsel %vm3438_vm4, %v3020_v46, 0  ;;  %v1621_v30 = vunpack.c.l.b16 %v1495_v55 }
 0x208   : > { %v1622_v33 = vunpack.c.l.b16 %v1496_v51  ;;  %v3050_v29 = vunpack.c.l.b16 %v1498_v11  ;;  %v3063_v16 = vunpack.c.l.b16 %v1443_v15  ;;  %v1550_v63 = vpack.c.b16 %v3056_v60, %v3058_v7 }
 0x209   : > { %v1734_v21 = vpack.c.b16 %v1729_v14, %v1728_v27  ;;  %v1598_v50 = vpack.c.b16 %v1594_v48, %v1593_v25  ;;  %v3071_v27 = vpack.c.b16 %v3048_v56, %v2948_v62  ;;  %v1502_v48 = vsel %vm3429_vm2, %v3052_v20, 0 }
 0x20a   : > { %v1626_v5 = vpack.c.b16 %v1622_v33, %v1621_v30  ;;  %v1549_v14 = vpack.c.b16 %v3065_v22, %v3063_v16  ;;  %v1640_v25 = vpack.c.b16 %v3050_v29, %v2984_v6  ;;  %v1512_v62 = vsel %vm2430_vm10, %v2965_v2, 0 }
 0x20b   : > { %1740 = vrot.lane.b32.xlu2 %v1734_v21, %s2266_s27  ;;  %1605 = vrot.lane.b32.xlu1 %v1598_v50, %s2258_s9  ;;  %v1501_v6 = vsel %vm3430_vm3, %v2946_v31, 0  ;;  %v1507_v21 = vsel %vm2614_vm12, %v3001_v52, 0  ;;  %v1467_v50 = vld [vmem:[#allocation3 + $0x29] sm:$0xff]  ;;  %v1658_v11 = vunpack.c.l.b16 %v1502_v48  ;;  %v1511_v51 = vsel %vm2401_vm7, %v2962_v17, 0 }
 0x20c   : > { %1627 = vrot.lane.b32.xlu0 %v1623_v28, %s2264_s15  ;;  %v1499_v38 = vld [vmem:[#allocation3 + $0x49] sm:$0xff]  ;;  %v1686_v3 = vunpack.c.l.b16 %v1512_v62  ;;  %v3099_v55 = vpack.c.bf16 %v1466_v13, %v1466_v13  ;;  %v1663_v42 = vunpack.c.l.b16 %v1507_v21  ;;  %v3101_v47 = vpack.c.bf16 %v1467_v50, %v1467_v50 }
 0x20d   : > { %v3054_v53 = vpack.c.bf16 %v1499_v38, %v1499_v38  ;;  %v1657_v38 = vunpack.c.l.b16 %v1501_v6  ;;  %v3103_v31 = vpack.c.bf16 %v1468_v59, %v1468_v59  ;;  %v1685_v15 = vunpack.c.l.b16 %v1511_v51  ;;  %v1452_v50 = vld [vmem:[#allocation3 + $0x30] sm:$0xff] }
 0x20e   : > { %v1524_v30 = vsel %vm3429_vm2, %v3099_v55, 0  ;;  %v1493_v17 = vsel %vm3440_vm0, %v3031_v26, 0  ;;  %v1523_v48 = vsel %vm3430_vm3, %v3052_v20, 0  ;;  %v1509_v41 = vld [vmem:[#allocation3 + $0x4f] sm:$0xff]  ;;  %v1517_v18 = vsel %vm3439_vm15, %v3020_v46, 0 }
 0x20f   : > { %v1508_v49 = vsel %vm2662_vm1, %v3054_v53, 0  ;;  %v1665_v33 = vpack.c.b16 %v1658_v11, %v1657_v38  ;;  %v1693_v34 = vpack.c.b16 %v1686_v3, %v1685_v15  ;;  %v1484_v57 = vsel %vm2737_vm13, %v3103_v31, 0  ;;  %v1451_v11 = vld [vmem:[#allocation3 + $0x28] sm:$0xff] }
 0x210   : > { %v1664_v28 = vunpack.c.l.b16 %v1508_v49  ;;  %v1725_v49 = vunpack.c.l.b16 %v1524_v30  ;;  %v1619_v62 = vunpack.c.l.b16 %v1493_v17  ;;  %v1592_v21 = vunpack.c.l.b16 %v1484_v57  ;;  %v1519_v30 = vld [vmem:[#allocation3 + $0x50] sm:$0xff] }
 0x211   : > { %v1724_v59 = vunpack.c.l.b16 %v1523_v48  ;;  %v1460_v3 = vpack.c.bf16 %v1452_v50, %v1452_v50  ;;  %v1459_v54 = vpack.c.bf16 %v1451_v11, %v1451_v11  ;;  %v1505_v15 = vsel %vm2733_vm9, %v3103_v31, 0 }
 0x212   : > { %v1668_v52 = vpack.c.b16 %v1664_v28, %v1663_v42  ;;  %v1515_v42 = vsel %vm3440_vm0, %v3024_v37, 0  ;;  %v1520_v48 = vpack.c.bf16 %v1519_v30, %v1519_v30  ;;  %v1510_v45 = vpack.c.bf16 %v1509_v41, %v1509_v41 }
 0x213   : > { %1633 = vrot.lane.b32.xlu2 %v1626_v5, %s2264_s15  ;;  %1708 = vrot.lane.b32.xlu1 %v3071_v27, %s2265_s26  ;;  %v1494_v5 = vsel %vm3441_vm6, %v3024_v37, 0  ;;  %v1732_v28 = vpack.c.b16 %v1725_v49, %v1724_v59  ;;  %v1661_v37 = vunpack.c.l.b16 %v1505_v15  ;;  %v1563_v17 = vunpack.c.l.b16 %v1459_v54 }
 0x214   : > { %1647 = vrot.lane.b32.xlu0 %v1640_v25, %s2263_s14  ;;  %v1483_v25 = vsel %vm2733_vm9, %v3101_v47, 0  ;;  %v1620_v13 = vunpack.c.l.b16 %v1494_v5  ;;  %v1492_v50 = vsel %vm3434_vm14, %v3026_v39, 0  ;;  %v1529_v59 = vsel %vm2614_vm12, %v3054_v53, 0  ;;  %vm3444_vm12 = vmmov %vm3436_vm5 }
 0x215   : > { %v1591_v6 = vunpack.c.l.b16 %v1483_v25  ;;  %v1662_v25 = vunpack.c.l.b16 %v1506_v23  ;;  %v1691_v44 = vunpack.c.l.b16 %v1517_v18  ;;  %vm3442_vm13 = vnez %v3355_v40 }
 0x216   : > { %v1625_v51 = vpack.c.b16 %v1620_v13, %v1619_v62  ;;  %v1706_v62 = vunpack.c.l.b16 %v1520_v48  ;;  %vm3443_vm9 = vnez %v3353_v36  ;;  %v1513_v54 = vsel %vm2520_vm8, %v3026_v39, 0  ;;  %v1824_v36 = vld [vmem:[%s3310_s5 + $0x20] sm:$0xf] }
 0x217   : > { %v1597_v38 = vpack.c.b16 %v1592_v21, %v1591_v6  ;;  %v1667_v49 = vpack.c.b16 %v1662_v25, %v1661_v37  ;;  %v1518_v21 = vsel %vm3438_vm4, %v1510_v45, 0  ;;  %v1481_v46 = vsel %vm3443_vm9, %v3052_v20, 0  ;;  %v2101_v45 = vld [vmem:[%s3310_s5] sm:$0xff]  ;;  %vm3448_vm4 = vmmov %vm3444_vm12 }
 0x218   : > { %v1707_v6 = vpack.c.b16 %v1706_v62, %v3050_v29  ;;  %v1491_v29 = vsel %vm2520_vm8, %v2965_v2, 0  ;;  %v1692_v11 = vunpack.c.l.b16 %v1518_v21  ;;  %v1504_v2 = vsel %vm3442_vm13, %v3101_v47, 0  ;;  %v2102_v62 = vld [vmem:[%s3310_s5 + $0x8] sm:$0xff] }
 0x219   : > { %v1617_v53 = vunpack.c.l.b16 %v1491_v29  ;;  %v1688_v26 = vunpack.c.l.b16 %v1514_v8  ;;  %v1503_v15 = vsel %vm3443_vm9, %v3099_v55, 0  ;;  %v1525_v58 = vsel %vm3443_vm9, %v3101_v47, 0 }
 0x21a   : > { %v1659_v23 = vunpack.c.l.b16 %v1503_v15  ;;  %v1526_v39 = vsel %vm3442_vm13, %v3103_v31, 0  ;;  %v1726_v20 = vunpack.c.l.b16 %v1525_v58  ;;  %v1638_v25 = vpack.c.b16 %v1563_v17, %v3048_v56  ;;  %v2104_v56 = vld [vmem:[%s3310_s5 + $0x18] sm:$0xff] }
 0x21b   : > { %1669 = vrot.lane.b32.xlu2 %v1665_v33, %s2267_s28  ;;  %1675 = vrot.lane.b32.xlu1 %v1668_v52, %s2267_s28  ;;  %v1516_v33 = vsel %vm3441_vm6, %v3022_v61, 0  ;;  %v1564_v52 = vunpack.c.l.b16 %v1460_v3  ;;  %v1521_v61 = vld [vmem:[#allocation3 + $0x51] sm:$0xff]  ;;  %v1846_v40 = vunpack.c.l.b16 %v1824_v36  ;;  %vm1865_vm8 = vcmask 1043456  }
 0x21c   : > { %1697 = vrot.lane.b32.xlu0 %v1693_v34, %s2268_s29  ;;  %v1689_v34 = vunpack.c.l.b16 %v1515_v42  ;;  %v1690_v5 = vunpack.c.l.b16 %v1516_v33  ;;  %v1522_v10 = vpack.c.bf16 %v1521_v61, %v1521_v61  ;;  %v1660_v33 = vunpack.c.l.b16 %v1504_v2 }
 0x21d   : > { %v1569_v57 = vpack.c.b16 %v1564_v52, %v1563_v17  ;;  %v1639_v13 = vpack.c.b16 %v2982_v24, %v1564_v52  ;;  %v1589_v52 = vunpack.c.l.b16 %v1481_v46  ;;  %v1851_v47 = vpack.c.b16 %v1846_v40, %v1846_v40  ;;  %v2103_v17 = vld [vmem:[%s3310_s5 + $0x10] sm:$0xff] }
 0x21e   : > { %v1695_v43 = vpack.c.b16 %v1690_v5, %v1689_v34  ;;  %v1530_v24 = vsel %vm2662_vm1, %v1522_v10, 0  ;;  %v1687_v34 = vunpack.c.l.b16 %v1513_v54  ;;  %v1666_v5 = vpack.c.b16 %v1660_v33, %v1659_v23 }
 0x21f   : > { %v1731_v3 = vunpack.c.l.b16 %v1530_v24  ;;  %v1440_v24 = vsel %vm2430_vm10, %v2994_v32, 0  ;;  %vm3445_vm1 = vcmask 130048   ;;  %vm3446_vm2 = vcmask 195584  }
 0x220   : > { %v1694_v30 = vpack.c.b16 %v1688_v26, %v1687_v34  ;;  %vm3447_vm3 = vcmask 261120   ;;  %vm1789_vm14 = vcmask 392192   ;;  %vm1798_vm10 = vcmask 457728   ;;  %vm3449_vm15 = vmmov %vm3445_vm1 }
 0x221   : > { %vm1807_vm5 = vcmask 523264   ;;  %vm3450_vm0 = vmmov %vm3446_vm2 }
 0x222   : > { %vm3451_vm6 = vmmov %vm3447_vm3 }
 0x223   : > { %1736 = vrot.lane.b32.xlu2 %v1732_v28, %s2266_s27  ;;  %1631 = vrot.lane.b32.xlu1 %v1625_v51, %s2264_s15  ;;  %v1618_v28 = vunpack.c.l.b16 %v1492_v50  ;;  %v1730_v51 = vunpack.c.l.b16 %v1529_v59  ;;  %vm3453_vm9 = vmmov %vm3445_vm1 }
 0x224   : > { %1603 = vrot.lane.b32.xlu0 %v1597_v38, %s2258_s9  ;;  %v1696_v38 = vpack.c.b16 %v1692_v11, %v1691_v44 }
 0x225   : > { %v1624_v4 = vpack.c.b16 %v1618_v28, %v1617_v53  ;;  %v1735_v42 = vpack.c.b16 %v1731_v3, %v1730_v51  ;;  %v1540_v28 = vunpack.c.l.b16 %v1440_v24 }
 0x22b   : > { %1575 = vrot.lane.b32.xlu2 %v1569_v57, %s2260_s11  ;;  %1701 = vrot.lane.b32.xlu1 %v1695_v43, %s2268_s29 }
 0x22c   : > { %1673 = vrot.lane.b32.xlu0 %v1667_v49, %s2267_s28  ;;  %v1867_v49 = vsel %vm1865_vm8, %v1851_v47, 0  ;;  %vm3454_vm8 = vmmov %vm3450_vm0 }
 0x22d   : > { %1872 = vmatpush.bf16.msra.mxu1 %v1867_v49  ;;  %2166 = vmatpush.bf16.msra.mxu3 %v1867_v49 }
 0x22f   : > { %v1572_v48 = vpop.permute.xlu2 %1571 }
 0x231   : > { %1873 = vmatpush.bf16.msra.mxu1 %v2104_v56  ;;  %2167 = vmatpush.bf16.msra.mxu3 %v2104_v56 }
 0x233   : > { %1645 = vrot.lane.b32.xlu2 %v1639_v13, %s2263_s14  ;;  %1714 = vrot.lane.b32.xlu1 %v1707_v6, %s2265_s26  ;;  %v1423_v6 = vld [vmem:[#allocation3 + $0x7] sm:$0xff] }
 0x234   : > { %1573 = vrot.lane.b32.xlu0 %v3071_v27, %s2260_s11  ;;  %v1482_v27 = vsel %vm3442_vm13, %v3099_v55, 0  ;;  %v1727_v55 = vunpack.c.l.b16 %v1526_v39  ;;  %v1431_v50 = vpack.c.bf16 %v1423_v6, %v1423_v6  ;;  %vm3452_vm13 = vmmov %vm3448_vm4  ;;  %v2230_v6 = vld [vmem:[%s3311_s6] ss:$0 sm:$0xff] }
 0x235   : > { %v1590_v0 = vunpack.c.l.b16 %v1482_v27  ;;  %1874 = vmatpush.bf16.msra.mxu1 %v2103_v17  ;;  %2168 = vmatpush.bf16.msra.mxu3 %v2103_v17 }
 0x236   : > { %v1733_v43 = vpack.c.b16 %v1727_v55, %v1726_v20  ;;  %v1439_v59 = vsel %vm2401_vm7, %v1431_v50, 0  ;;  %vm1780_vm7 = vcmask 326656  }
 0x237   : > { %v1596_v37 = vpack.c.b16 %v1590_v0, %v1589_v52  ;;  %v1539_v11 = vunpack.c.l.b16 %v1439_v59 }
 0x239   : > { %1875 = vmatpush.bf16.msra.mxu1 %v2102_v62  ;;  %2169 = vmatpush.bf16.msra.mxu3 %v2102_v62  ;;  %v1547_v3 = vpack.c.b16 %v1540_v28, %v1539_v11 }
 0x23b   : > { %1703 = vrot.lane.b32.xlu2 %v1696_v38, %s2268_s29  ;;  %1629 = vrot.lane.b32.xlu1 %v1624_v4, %s2264_s15  ;;  %v1746_v53 = vsel %vm3444_vm12, %v1547_v3, %v1572_v48  ;;  %vm3455_vm12 = vmmov %vm3447_vm3 }
 0x23c   : > { %1742 = vrot.lane.b32.xlu0 %v1735_v42, %s2266_s27 }
 0x23d   : > { %1876 = vmatpush.bf16.msra.mxu1 %v2101_v45  ;;  %2170 = vmatpush.bf16.msra.mxu3 %v2101_v45 }
 0x243   : > { %1601 = vrot.lane.b32.xlu2 %v1596_v37, %s2258_s9  ;;  %1699 = vrot.lane.b32.xlu1 %v1694_v30, %s2268_s29 }
 0x244   : > { %1671 = vrot.lane.b32.xlu0 %v1666_v5, %s2267_s28 }
 0x24b   : > { %1643 = vrot.lane.b32.xlu2 %v1638_v25, %s2263_s14 }
 0x24c   : > { %1738 = vrot.lane.b32.xlu0 %v1733_v43, %s2266_s27 }
 0x253   : > { %1710 = vrot.lane.b32.xlu2 %v1569_v57, %s2265_s26  ;;  %v1642_v57 = vpop.permute.xlu1 %1641 }
 0x25b   : > { %v1600_v10 = vpop.permute.xlu1 %1599 }
 0x25c   : > { %v1757_v4 = vsel %vm3445_vm1, %v1746_v53, %v1600_v10  ;;  %vm3456_vm1 = vmmov %vm3448_vm4 }
 0x265   : > { %v3203_v31 = vpop.permute.xlu2 %1740 }
 0x26d   : > { %v3211_v41 = vpop.permute.xlu2 %1633  ;;  %v1713_v61 = vpop.permute.xlu0 %1712 }
 0x275   : > { %v1578_v13 = vpop.permute.xlu0 %1577  ;;  %v1670_v21 = vpop.permute.xlu2 %1669 }
 0x276   : > { %v1755_v55 = vsel %vm3452_vm13, %v1550_v63, %v1578_v13 }
 0x27d   : > { %v1606_v18 = vpop.permute.xlu1 %1605  ;;  %v1737_v51 = vpop.permute.xlu2 %1736 }
 0x27e   : > { %v1628_v29 = vpop.permute.xlu0 %1627  ;;  %v1763_v43 = vsel %vm3453_vm9, %v1755_v55, %v1606_v18 }
 0x27f   : > { %v1765_v42 = vsel %vm3446_vm2, %v1757_v4, %v1628_v29  ;;  %v1771_v48 = vsel %vm3454_vm8, %v1763_v43, %v3211_v41  ;;  %vm3457_vm2 = vmmov %vm3453_vm9 }
 0x280   : > { %v1773_v1 = vsel %vm3447_vm3, %v1765_v42, %v1642_v57  ;;  %vm3458_vm3 = vmmov %vm3450_vm0 }
 0x281   : > { %v1782_v32 = vsel %vm1780_vm7, %v1773_v1, %v1670_v21 }
 0x285   : > { %v1709_v44 = vpop.permute.xlu1 %1708  ;;  %v1576_v27 = vpop.permute.xlu2 %1575 }
 0x286   : > { %v1648_v38 = vpop.permute.xlu0 %1647  ;;  %v1752_v33 = vsel %vm3448_vm4, %v1549_v14, %v1576_v27  ;;  %vm3459_vm4 = vmmov %vm3451_vm6 }
 0x287   : > { %v1779_v36 = vsel %vm3455_vm12, %v1771_v48, %v1648_v38 }
 0x28d   : > { %v1676_v19 = vpop.permute.xlu1 %1675  ;;  %v1646_v0 = vpop.permute.xlu2 %1645 }
 0x28e   : > { %v1698_v8 = vpop.permute.xlu0 %1697 }
 0x28f   : > { %v1791_v2 = vsel %vm1789_vm14, %v1782_v32, %v1698_v8 }
 0x290   : > { %v1800_v46 = vsel %vm1798_vm10, %v1791_v2, %v1709_v44 }
 0x291   : > { %v1809_v54 = vsel %vm1807_vm5, %v1800_v46, %v1737_v51 }
 0x292   : > { %2088 = vmatmul.msk.bf16.vlgmr.msra.gmra.mxu1 %vm1856_vm11, %v1809_v54 }
 0x295   : > { %v1632_v26 = vpop.permute.xlu1 %1631  ;;  %v1704_v5 = vpop.permute.xlu2 %1703 }
 0x296   : > { %v1604_v15 = vpop.permute.xlu0 %1603 }
 0x297   : > { %v1761_v52 = vsel %vm3449_vm15, %v1752_v33, %v1604_v15 }
 0x298   : > { %v1769_v34 = vsel %vm3450_vm0, %v1761_v52, %v1632_v26 }
 0x299   : > { %v1777_v37 = vsel %vm3451_vm6, %v1769_v34, %v1646_v0 }
 0x29d   : > { %v1702_v23 = vpop.permute.xlu1 %1701  ;;  %v1602_v25 = vpop.permute.xlu2 %1601 }
 0x29e   : > { %v1674_v30 = vpop.permute.xlu0 %1673 }
 0x29f   : > { %v1786_v58 = vsel %vm1780_vm7, %v1777_v37, %v1674_v30 }
 0x2a0   : > { %v1795_v39 = vsel %vm1789_vm14, %v1786_v58, %v1702_v23 }
 0x2a1   : > { %v1804_v20 = vsel %vm1798_vm10, %v1795_v39, %v1713_v61 }
 0x2a2   : > { %v1813_v16 = vsel %vm1807_vm5, %v1804_v20, %v3203_v31  ;;  %v1788_v31 = vsel %vm1780_vm7, %v1779_v36, %v1676_v19 }
 0x2a3   : > { %2090 = vmatmul.msk.bf16.vlgmr.msra.gmra.mxu3 %vm1856_vm11, %v1813_v16  ;;  %v1797_v49 = vsel %vm1789_vm14, %v1788_v31, %v1704_v5 }
 0x2a5   : > { %v1715_v22 = vpop.permute.xlu1 %1714  ;;  %v1644_v56 = vpop.permute.xlu2 %1643 }
 0x2a6   : > { %v1574_v14 = vpop.permute.xlu0 %1573  ;;  %v1806_v7 = vsel %vm1798_vm10, %v1797_v49, %v1715_v22 }
 0x2a7   : > { %v1749_v60 = vsel %vm3456_vm1, %v1548_v9, %v1574_v14 }
 0x2a8   : > { %v1759_v17 = vsel %vm3457_vm2, %v1749_v60, %v1602_v25 }
 0x2ad   : > { %v1630_v40 = vpop.permute.xlu1 %1629  ;;  %v1711_v9 = vpop.permute.xlu2 %1710 }
 0x2ae   : > { %v1743_v47 = vpop.permute.xlu0 %1742  ;;  %v1767_v57 = vsel %vm3458_vm3, %v1759_v17, %v1630_v40 }
 0x2af   : > { %v1815_v63 = vsel %vm1807_vm5, %v1806_v7, %v1743_v47  ;;  %v1775_v61 = vsel %vm3459_vm4, %v1767_v57, %v1644_v56 }
 0x2b3   : > { %2091 = vmatmul.msk.bf16.gmra.mxu3 %vm1856_vm11, %v1815_v63 }
 0x2b5   : > { %v1700_v62 = vpop.permute.xlu1 %1699 }
 0x2b6   : > { %v1672_v41 = vpop.permute.xlu0 %1671 }
 0x2b7   : > { %v1784_v35 = vsel %vm1780_vm7, %v1775_v61, %v1672_v41  ;;  %vm1914_vm7 = vcmask 60416  }
 0x2b8   : > { %v1793_v12 = vsel %vm1789_vm14, %v1784_v35, %v1700_v62 }
 0x2b9   : > { %v1802_v10 = vsel %vm1798_vm10, %v1793_v12, %v1711_v9 }
 0x2be   : > { %v1739_v45 = vpop.permute.xlu0 %1738 }
 0x2bf   : > { %v1811_v13 = vsel %vm1807_vm5, %v1802_v10, %v1739_v45 }
 0x2c0   : > { %2089 = vmatmul.msk.bf16.gmra.mxu1 %vm1856_vm11, %v1811_v13 }
 0x30f   : > { %v1878_v21 = vpop.f32.mrf.mxu1 }
 0x310   : > { %v1879_v50 = vadd.f32 %v2230_v6, %v1878_v21 }
 0x312   : > { %v1898_v59 = vmax.f32 %v1879_v50, 0.0 }
 0x314   : > { %v1906_v24 = vpack.c.bf16 %v1898_v59, %v1898_v59 }
 0x316   : > { %1915 = vst.msk [vmem:[%s3278_s22] sm:$0xf] %vm1914_vm7, %v1906_v24 }
 0x317   : > { %v1880_v18 = vpop.f32.mrf.mxu1 }
 0x318   : > { %v1881_v29 = vadd.f32 %v2230_v6, %v1880_v18 }
 0x31a   : > { %v1899_v11 = vmax.f32 %v1881_v29, 0.0 }
 0x31c   : > { %v1907_v28 = vpack.c.bf16 %v1899_v11, %v1899_v11 }
 0x31e   : > { %1916 = vst.msk [vmem:[%s3278_s22 + $0x4] sm:$0xf] %vm1914_vm7, %v1907_v28 }
 0x326   : > { %v1888_v51 = vpop.f32.mrf.mxu3 }
 0x327   : > { %v1889_v3 = vadd.f32 %v2230_v6, %v1888_v51 }
 0x329   : > { %v1902_v44 = vmax.f32 %v1889_v3, 0.0 }
 0x32b   : > { %v1910_v53 = vpack.c.bf16 %v1902_v44, %v1902_v44 }
 0x32d   : > { %1919 = vst.msk [vmem:[%s3278_s22 + $0x10] sm:$0xf] %vm1914_vm7, %v1910_v53 }
 0x32e   : > { %v1890_v38 = vpop.f32.mrf.mxu3 }
 0x32f   : > { %v1891_v4 = vadd.f32 %v2230_v6, %v1890_v38 }
 0x331   : > { %v1903_v42 = vmax.f32 %v1891_v4, 0.0 }
 0x333   : > { %v1911_v1 = vpack.c.bf16 %v1903_v42, %v1903_v42 }
 0x335   : > { %1920 = vst.msk [vmem:[%s3278_s22 + $0x14] sm:$0xf] %vm1914_vm7, %v1911_v1 }
 0x336   : > { %v1893_v27 = vpop.f32.mrf.mxu3 }
 0x337   : > { %v1894_v19 = vadd.f32 %v2230_v6, %v1893_v27 }
 0x339   : > { %v1904_v32 = vmax.f32 %v1894_v19, 0.0 }
 0x33b   : > { %v1912_v8 = vpack.c.bf16 %v1904_v32, %v1904_v32 }
 0x33d   : > { %1921 = vst.msk [vmem:[%s3278_s22 + $0x18] sm:$0xf] %vm1914_vm7, %v1912_v8  ;;  %v1883_v2 = vpop.f32.mrf.mxu1 }
 0x33e   : > { %v1884_v46 = vadd.f32 %v2230_v6, %v1883_v2  ;;  %v1895_v54 = vpop.f32.mrf.mxu3 }
 0x33f   : > { %v1896_v0 = vadd.f32 %v2230_v6, %v1895_v54 }
 0x340   : > { %v1900_v26 = vmax.f32 %v1884_v46, 0.0 }
 0x341   : > { %v1905_v15 = vmax.f32 %v1896_v0, 0.0 }
 0x342   : > { %v1908_v33 = vpack.c.bf16 %v1900_v26, %v1900_v26 }
 0x343   : > { %v1913_v52 = vpack.c.bf16 %v1905_v15, %v1905_v15 }
 0x344   : > { %1917 = vst.msk [vmem:[%s3278_s22 + $0x8] sm:$0xf] %vm1914_vm7, %v1908_v33 }
 0x345   : > { %1922 = vst.msk [vmem:[%s3278_s22 + $0x1c] sm:$0xf] %vm1914_vm7, %v1913_v52  ;;  %v1885_v34 = vpop.f32.mrf.mxu1 }
 0x346   : > { %v1886_v23 = vadd.f32 %v2230_v6, %v1885_v34 }
 0x348   : > { %v1901_v37 = vmax.f32 %v1886_v23, 0.0 }
 0x34a   : > { %v1909_v30 = vpack.c.bf16 %v1901_v37, %v1901_v37 }
 0x34c   : > { %1918 = vst.msk [vmem:[%s3278_s22 + $0xc] sm:$0xf] %vm1914_vm7, %v1909_v30 }
 0x34d PF: > { %s17_s2 = sadd.s32 1, %s2253_s2   ;;  %s3460_s23 = smov %s2249_s24 }
 0x34e   : > { %p14_p5 = scmp.ge.s32.totalorder %s17_s2, 4   ;;  %s3461_s24 = smov %s3463_s25 }
 0x350   :  { %16 = sbr.rel (!%p14_p5) target bundleno = 2 (0x2), region = 104 }

</bundles_post_ra>
